<compile_context>
chip_gen: v7x
topology: tpu7x:2x2x1
jax: 0.10.0
libtpu: 0.0.40
codegen_flags: <defaults>
</compile_context>

<pallas_src>
import functools

import jax
import jax.numpy as jnp
from jax import lax
from jax.experimental import pallas as pl
from jax.experimental.pallas import tpu as pltpu


LANE = 128      # TPU lane width
SUBLANE = 8     # f32 sublane height


def _round_up(x, m):
    return (x + m - 1) // m * m


# ----------------------------------------------------------------------------
# Pallas kernel 1: row-tiled matmul + bias (+ optional ReLU)
#   - grid over M row tiles, "parallel" (v7x dual-TC splits rows)
#   - bf16 LHS/RHS, f32 accumulation/bias/ReLU, configurable output dtype
#   - callers always pad N (output lanes) to a multiple of 128 -> lane-dense
#     stores (no masked vst.msk).
# ----------------------------------------------------------------------------
def _matmul_bias_act_kernel(x_ref, w_ref, b_ref, o_ref, *, apply_relu):
    y = jnp.dot(x_ref[...], w_ref[...], preferred_element_type=jnp.float32)
    y = y + b_ref[...]
    if apply_relu:
        y = jnp.maximum(y, 0.0)
    o_ref[...] = y.astype(o_ref.dtype)


def matmul_bias_act(x, w, b, *, apply_relu, out_dtype, block_m=256):
    M, K = x.shape
    N = w.shape[1]
    Mp = _round_up(M, SUBLANE)
    bm = min(block_m, Mp)
    Mp = _round_up(Mp, bm)
    if Mp != M:
        x = jnp.pad(x, ((0, Mp - M), (0, 0)))
    kernel = functools.partial(_matmul_bias_act_kernel, apply_relu=apply_relu)
    out = pl.pallas_call(
        kernel,
        grid=(Mp // bm,),
        in_specs=[
            pl.BlockSpec((bm, K), lambda i: (i, 0)),
            pl.BlockSpec((K, N), lambda i: (0, 0)),
            pl.BlockSpec((1, N), lambda i: (0, 0)),
        ],
        out_specs=pl.BlockSpec((bm, N), lambda i: (i, 0)),
        out_shape=jax.ShapeDtypeStruct((Mp, N), out_dtype),
        compiler_params=pltpu.CompilerParams(
            dimension_semantics=("parallel",),
            vmem_limit_bytes=32 * 1024 * 1024,
        ),
    )(x, w, b)
    return out[:M] if Mp != M else out


# ----------------------------------------------------------------------------
# Pallas kernel 2: fused conv3 (1x1 output) + ReLU + LSTM input projection.
#   Two back-to-back MXU calls per row tile; only the (bm, 4Hp) xg slab goes
#   back to HBM (no conv3 activation / feats intermediate).
# ----------------------------------------------------------------------------
def _conv3_proj_kernel(p_ref, w3_ref, b3_ref, wih_ref, bih_ref, o_ref):
    y = jnp.dot(p_ref[...], w3_ref[...], preferred_element_type=jnp.float32)
    y = jnp.maximum(y + b3_ref[...], 0.0)
    xg = jnp.dot(y.astype(wih_ref.dtype), wih_ref[...],
                 preferred_element_type=jnp.float32)
    o_ref[...] = xg + bih_ref[...]


def conv3_proj(p, w3, b3, wih, bih, *, block_m=256):
    M, K = p.shape
    C3 = w3.shape[1]
    G = wih.shape[1]
    Mp = _round_up(M, SUBLANE)
    bm = min(block_m, Mp)
    Mp = _round_up(Mp, bm)
    if Mp != M:
        p = jnp.pad(p, ((0, Mp - M), (0, 0)))
    out = pl.pallas_call(
        _conv3_proj_kernel,
        grid=(Mp // bm,),
        in_specs=[
            pl.BlockSpec((bm, K), lambda i: (i, 0)),
            pl.BlockSpec((K, C3), lambda i: (0, 0)),
            pl.BlockSpec((1, C3), lambda i: (0, 0)),
            pl.BlockSpec((C3, G), lambda i: (0, 0)),
            pl.BlockSpec((1, G), lambda i: (0, 0)),
        ],
        out_specs=pl.BlockSpec((bm, G), lambda i: (i, 0)),
        out_shape=jax.ShapeDtypeStruct((Mp, G), jnp.float32),
        compiler_params=pltpu.CompilerParams(
            dimension_semantics=("parallel",),
            vmem_limit_bytes=32 * 1024 * 1024,
        ),
    )(p, w3, b3, wih, bih)
    return out[:M] if Mp != M else out


# ----------------------------------------------------------------------------
# im2col glue (pure slicing/stack; the matmul hot path is in Pallas)
# ----------------------------------------------------------------------------
def im2col_nhwc(x, k, s):
    """(N, H, W, C) -> (N*OH*OW, k*k*C) patches in (kh, kw, c) feature order."""
    N, H, W, C = x.shape
    OH = (H - k) // s + 1
    OW = (W - k) // s + 1
    he = s * (OH - 1) + 1
    we = s * (OW - 1) + 1
    cols = [x[:, dh:dh + he:s, dw:dw + we:s, :]
            for dh in range(k) for dw in range(k)]           # each (N, OH, OW, C)
    p = jnp.stack(cols, axis=3)                              # (N, OH, OW, k*k, C)
    return p.reshape(N * OH * OW, k * k * C), OH, OW


def conv2d_relu_nhwc(x, wmat, bvec, k, stride):
    """NHWC VALID conv + bias + ReLU via im2col + Pallas matmul (bf16 operands).
    `wmat` is prepacked (k*k*Cin, cout_pad) bf16; output channels stay padded to
    `cout_pad` lanes (lane-dense stores); callers slice [..., :Cout] lazily."""
    N = x.shape[0]
    cout_pad = wmat.shape[1]
    patches, OH, OW = im2col_nhwc(x, k, stride)
    y = matmul_bias_act(patches, wmat, bvec, apply_relu=True, out_dtype=jnp.bfloat16)
    return y.reshape(N, OH, OW, cout_pad)


# ----------------------------------------------------------------------------
# Pallas kernel 3: LSTM recurrence + per-step fused actor/critic head.
#   grid=(T,) "arbitrary"; xg streamed per step via BlockSpec pipeline; h/c
#   carried in the resident hf/cf output blocks; gate slices are 128-lane slabs.
#   Gate order is PyTorch's (i, f, g, o).
# ----------------------------------------------------------------------------
def _lstm_step_kernel(xg_ref, whh_ref, h0_ref, c0_ref, wh_ref, bh_ref,
                      head_ref, hf_ref, cf_ref, *, hid_p):
    t = pl.program_id(0)

    @pl.when(t == 0)
    def _():
        hf_ref[...] = h0_ref[...]
        cf_ref[...] = c0_ref[...]

    h = hf_ref[...]
    c = cf_ref[...]
    gates = xg_ref[...] + jnp.dot(h, whh_ref[...],
                                  preferred_element_type=jnp.float32)   # (Bp, 4Hp)
    i_g = jax.nn.sigmoid(gates[:, 0 * hid_p:1 * hid_p])
    f_g = jax.nn.sigmoid(gates[:, 1 * hid_p:2 * hid_p])
    g_g = jnp.tanh(gates[:, 2 * hid_p:3 * hid_p])
    o_g = jax.nn.sigmoid(gates[:, 3 * hid_p:4 * hid_p])
    c_n = f_g * c + i_g * g_g
    h_n = o_g * jnp.tanh(c_n)
    hf_ref[...] = h_n
    cf_ref[...] = c_n
    # merged actor+critic head, lane-dense 128-wide output: [logits | value | 0..]
    head_ref[...] = jnp.dot(h_n.astype(wh_ref.dtype), wh_ref[...],
                            preferred_element_type=jnp.float32) + bh_ref[...]


def lstm_actor_critic(xg, whh, h0, c0, w_head, b_head, *, seq_len, batch_p, hid_p, ap):
    g4 = 4 * hid_p
    kernel = functools.partial(_lstm_step_kernel, hid_p=hid_p)
    return pl.pallas_call(
        kernel,
        grid=(seq_len,),
        in_specs=[
            pl.BlockSpec((None, batch_p, g4), lambda t: (t, 0, 0)),   # xg, streamed
            pl.BlockSpec((hid_p, g4), lambda t: (0, 0)),              # whh (f32)
            pl.BlockSpec((batch_p, hid_p), lambda t: (0, 0)),         # h0
            pl.BlockSpec((batch_p, hid_p), lambda t: (0, 0)),         # c0
            pl.BlockSpec((hid_p, ap), lambda t: (0, 0)),              # head W (bf16)
            pl.BlockSpec((1, ap), lambda t: (0, 0)),                  # head b
        ],
        out_specs=(
            pl.BlockSpec((None, batch_p, ap), lambda t: (t, 0, 0)),   # per-step head
            pl.BlockSpec((batch_p, hid_p), lambda t: (0, 0)),         # final h (carry)
            pl.BlockSpec((batch_p, hid_p), lambda t: (0, 0)),         # final c (carry)
        ),
        out_shape=(
            jax.ShapeDtypeStruct((seq_len, batch_p, ap), jnp.float32),
            jax.ShapeDtypeStruct((batch_p, hid_p), jnp.float32),
            jax.ShapeDtypeStruct((batch_p, hid_p), jnp.float32),
        ),
        compiler_params=pltpu.CompilerParams(
            dimension_semantics=("arbitrary",),
            vmem_limit_bytes=32 * 1024 * 1024,
        ),
    )(xg, whh, h0, c0, w_head, b_head)


# ----------------------------------------------------------------------------
# Parameters, one-time weight preparation, full forward pass
# ----------------------------------------------------------------------------
def conv_out_hw(input_shape):
    _, H, W = input_shape
    def o(d, k, s): return (d - k) // s + 1
    return (o(o(o(H, 8, 4), 4, 2), 3, 1), o(o(o(W, 8, 4), 4, 2), 3, 1))


def init_params(key, input_shape, num_actions, hidden_size):
    """Raw parameters in PyTorch layouts (OIHW conv weights, (D, 4H) lstm_wih
    with rows in torch's CHW flatten order)."""
    C, _, _ = input_shape
    oh, ow = conv_out_hw(input_shape)
    D = 64 * oh * ow
    ks = jax.random.split(key, 14)
    f32 = jnp.float32
    sc = 0.05

    def w(k, shape):
        return jax.random.normal(k, shape, f32) * sc

    return dict(
        conv1_w=w(ks[0], (32, C, 8, 8)), conv1_b=w(ks[1], (32,)),
        conv2_w=w(ks[2], (64, 32, 4, 4)), conv2_b=w(ks[3], (64,)),
        conv3_w=w(ks[4], (64, 64, 3, 3)), conv3_b=w(ks[5], (64,)),
        lstm_wih=w(ks[6], (D, 4 * hidden_size)),
        lstm_whh=w(ks[7], (hidden_size, 4 * hidden_size)),
        lstm_b=w(ks[8], (1, 4 * hidden_size)),
        actor_w=w(ks[9], (hidden_size, num_actions)), actor_b=w(ks[10], (1, num_actions)),
        critic_w=w(ks[11], (hidden_size, 1)), critic_b=w(ks[12], (1, 1)),
    )


def prepare_params(params, input_shape, hidden_size):
    """One-time repacking/padding/casting of weights for the kernels (hoisted
    out of the forward path; ~20 small XLA ops executed exactly once)."""
    OH3, OW3 = conv_out_hw(input_shape)
    Hh = hidden_size
    Hp = _round_up(Hh, LANE)
    A = params["actor_w"].shape[1]
    Ap = _round_up(A + 1, LANE)
    bf = jnp.bfloat16
    f32 = jnp.float32

    def conv_wmat(w, cout_pad=LANE):
        Cout, Cin, k, _ = w.shape
        m = jnp.transpose(w, (2, 3, 1, 0)).reshape(k * k * Cin, Cout)  # rows (kh,kw,ci)
        return jnp.pad(m, ((0, 0), (0, cout_pad - Cout))).astype(bf)

    def conv_bvec(b, cout_pad=LANE):
        return jnp.pad(b, (0, cout_pad - b.shape[0])).reshape(1, cout_pad).astype(f32)

    def pad_gates(m):  # pad each (i, f, g, o) gate block from Hh to a 128-lane slab
        g = m.reshape(m.shape[0], 4, Hh)
        return jnp.pad(g, ((0, 0), (0, 0), (0, Hp - Hh))).reshape(m.shape[0], 4 * Hp)

    prep = dict(
        conv1_w=conv_wmat(params["conv1_w"]), conv1_b=conv_bvec(params["conv1_b"]),
        conv2_w=conv_wmat(params["conv2_w"]), conv2_b=conv_bvec(params["conv2_b"]),
        whh=pad_gates(jnp.pad(params["lstm_whh"], ((0, Hp - Hh), (0, 0)))).astype(f32),
        b_lstm=pad_gates(params["lstm_b"]).astype(f32),
    )

    wih = params["lstm_wih"]                               # rows in torch CHW order
    if OH3 * OW3 == 1:
        # conv3 output is 1x1: CHW flatten == channel order; fused conv3+proj path
        w3 = params["conv3_w"]
        Cout3, Cin3, k3, _ = w3.shape
        prep["conv3_w_fused"] = (jnp.transpose(w3, (2, 3, 1, 0))
                                 .reshape(k3 * k3 * Cin3, Cout3).astype(bf))
        prep["conv3_b_fused"] = params["conv3_b"].reshape(1, Cout3).astype(f32)
        wih_rows = wih
    else:
        # general path: permute rows CHW -> HWC so NHWC flatten matches torch .view
        prep["conv3_w"] = conv_wmat(params["conv3_w"])
        prep["conv3_b"] = conv_bvec(params["conv3_b"])
        wih_rows = jnp.transpose(wih.reshape(64, OH3, OW3, 4 * Hh),
                                 (1, 2, 0, 3)).reshape(-1, 4 * Hh)
    prep["wih"] = pad_gates(wih_rows).astype(bf)

    # merged actor+critic head, padded to 128 output lanes: [logits | value | 0..]
    w_head = jnp.concatenate([params["actor_w"], params["critic_w"]], axis=1)
    prep["w_head"] = jnp.pad(w_head, ((0, Hp - Hh), (0, Ap - (A + 1)))).astype(bf)
    b_head = jnp.concatenate([params["actor_b"], params["critic_b"]], axis=1)
    prep["b_head"] = jnp.pad(b_head, ((0, 0), (0, Ap - (A + 1)))).astype(f32)
    return prep


def ppo_forward(prep, x, *, hidden_size, num_actions, lstm_state=None, dones=None):
    B, T, C, H, W = x.shape
    Hh = hidden_size
    Hp = _round_up(Hh, LANE)
    Bp = _round_up(B, SUBLANE)
    A = num_actions
    Ap = _round_up(A + 1, LANE)
    OH3, OW3 = conv_out_hw((C, H, W))
    D = 64 * OH3 * OW3

    # ---- conv stack: time-major NHWC bf16, single relayout/cast at the top ----
    xf = jnp.transpose(x, (1, 0, 3, 4, 2)).reshape(T * B, H, W, C).astype(jnp.bfloat16)
    y = conv2d_relu_nhwc(xf, prep["conv1_w"], prep["conv1_b"], 8, 4)
    y = conv2d_relu_nhwc(y[..., :32], prep["conv2_w"], prep["conv2_b"], 4, 2)

    if OH3 == 1 and OW3 == 1:
        # conv3's im2col is the identity: fuse conv3 + ReLU + LSTM input projection
        p3 = y[:, :, :, :64].reshape(T * B, 9 * 64)
        xg_flat = conv3_proj(p3, prep["conv3_w_fused"], prep["conv3_b_fused"],
                             prep["wih"], prep["b_lstm"])
    else:
        y = conv2d_relu_nhwc(y[..., :64], prep["conv3_w"], prep["conv3_b"], 3, 1)
        feats = y[..., :64].reshape(T * B, D)
        xg_flat = matmul_bias_act(feats, prep["wih"], prep["b_lstm"],
                                  apply_relu=False, out_dtype=jnp.float32)

    # batch-pad AFTER the bias add (pad rows are exactly zero -> stay zero in the
    # recurrence); rows are already in (t, b) order thanks to the top transpose.
    xg = xg_flat[:T * B].reshape(T, B, 4 * Hp)
    xg = jnp.pad(xg, ((0, 0), (0, Bp - B), (0, 0)))

    # ---- initial LSTM state (dones resets the *initial* state, like the module) ----
    if lstm_state is None:
        h0 = jnp.zeros((B, Hh), jnp.float32)
        c0 = jnp.zeros((B, Hh), jnp.float32)
    else:
        h, c = lstm_state                                    # (1, B, Hh) each
        h0, c0 = h[0], c[0]
    if dones is not None:
        keep = (1.0 - dones.astype(jnp.float32))[:, None]
        h0 = h0 * keep
        c0 = c0 * keep
    h0p = jnp.pad(h0, ((0, Bp - B), (0, Hp - Hh)))
    c0p = jnp.pad(c0, ((0, Bp - B), (0, Hp - Hh)))

    head, h_f, c_f = lstm_actor_critic(xg, prep["whh"], h0p, c0p,
                                       prep["w_head"], prep["b_head"],
                                       seq_len=T, batch_p=Bp, hid_p=Hp, ap=Ap)
    logits = jnp.transpose(head[:, :B, :A], (1, 0, 2))        # (B, T, A)
    values = jnp.transpose(head[:, :B, A], (1, 0))            # (B, T)
    return logits, values, (h_f[:B, :Hh][None], c_f[:B, :Hh][None])


# ----------------------------------------------------------------------------
# Plain-JAX reference (for correctness check; f32 HIGHEST precision)
# ----------------------------------------------------------------------------
def ppo_forward_ref(params, x, hidden_size):
    B, T, C, H, W = x.shape
    xf = x.reshape(B * T, C, H, W).astype(jnp.float32)
    hi = lax.Precision.HIGHEST

    def conv(z, w, b, s):
        o = lax.conv_general_dilated(z, w, (s, s), "VALID",
                                     dimension_numbers=("NCHW", "OIHW", "NCHW"),
                                     precision=hi)
        return jnp.maximum(o + b[None, :, None, None], 0.0)

    y = conv(xf, params["conv1_w"], params["conv1_b"], 4)
    y = conv(y, params["conv2_w"], params["conv2_b"], 2)
    y = conv(y, params["conv3_w"], params["conv3_b"], 1)
    conv_out = y.reshape(B, T, -1)

    Hh = hidden_size
    Wih, Whh, bb = params["lstm_wih"], params["lstm_whh"], params["lstm_b"]

    def step(carry, xt):
        h, c = carry
        g = jnp.dot(xt, Wih, precision=hi) + jnp.dot(h, Whh, precision=hi) + bb
        i = jax.nn.sigmoid(g[:, :Hh]); f = jax.nn.sigmoid(g[:, Hh:2 * Hh])
        gg = jnp.tanh(g[:, 2 * Hh:3 * Hh]); o = jax.nn.sigmoid(g[:, 3 * Hh:])
        c = f * c + i * gg
        h = o * jnp.tanh(c)
        return (h, c), h

    h0 = jnp.zeros((B, Hh), jnp.float32)
    (h_f, c_f), hs = lax.scan(step, (h0, h0), jnp.transpose(conv_out, (1, 0, 2)))
    hs = jnp.transpose(hs, (1, 0, 2))                         # (B, T, Hh)
    logits = jnp.dot(hs, params["actor_w"], precision=hi) + params["actor_b"][0]
    values = (jnp.dot(hs, params["critic_w"], precision=hi) + params["critic_b"][0])[..., 0]
    return logits, values, (h_f[None], c_f[None])


# ----------------------------------------------------------------------------
if __name__ == "__main__":
    # Small shapes consistent with the module:
    # input_shape=(4, 36, 36) -> conv output 64*1*1 = 64, hidden_size=32, 6 actions.
    input_shape = (4, 36, 36)
    num_actions = 6
    hidden_size = 32
    B, T = 2, 8

    key = jax.random.PRNGKey(0)
    kp, kx = jax.random.split(key)
    params = init_params(kp, input_shape, num_actions, hidden_size)
    x = jax.random.normal(kx, (B, T) + input_shape, jnp.float32)

    # one-time weight preparation (hoisted out of the jitted forward path)
    prep = prepare_params(params, input_shape, hidden_size)

    forward = jax.jit(functools.partial(ppo_forward, hidden_size=hidden_size,
                                        num_actions=num_actions))
    logits, values, (h, c) = forward(prep, x)
    jax.block_until_ready((logits, values, h, c))

    # sanity check against plain-JAX f32 reference (bf16 MXU operands -> ~1e-2 drift)
    r_logits, r_values, (r_h, r_c) = ppo_forward_ref(params, x, hidden_size)
    assert logits.shape == (B, T, num_actions)
    assert values.shape == (B, T)
    assert h.shape == (1, B, hidden_size) and c.shape == (1, B, hidden_size)
    assert jnp.allclose(logits, r_logits, atol=2e-2, rtol=2e-2)
    assert jnp.allclose(values, r_values, atol=2e-2, rtol=2e-2)
    assert jnp.allclose(h, r_h, atol=2e-2, rtol=2e-2)
    assert jnp.allclose(c, r_c, atol=2e-2, rtol=2e-2)

    print("KERNEL_OK")
</pallas_src>

<mosaic_0001>
module attributes {stable_mosaic.version = 11 : i64} {
  func.func @_matmul_bias_act_kernel(%arg0: i32, %arg1: memref<256x256xbf16, #tpu.memory_space<vmem>>, %arg2: memref<256x128xbf16, #tpu.memory_space<vmem>>, %arg3: memref<1x128xf32, #tpu.memory_space<vmem>>, %arg4: memref<256x128xbf16, #tpu.memory_space<vmem>>) attributes {dimension_semantics = [#tpu.dimension_semantics<parallel>], iteration_bounds = array<i64: 4>, scalar_prefetch = 0 : i64, scratch_operands = 0 : i64, tpu.core_type = #tpu.core_type<tc>, window_params = [{transform_indices = @transform_0, window_bounds = array<i64: 256, 256>}, {pipeline_mode = #tpu.pipeline_mode<synchronous>, transform_indices = @transform_1, window_bounds = array<i64: 256, 128>}, {pipeline_mode = #tpu.pipeline_mode<synchronous>, transform_indices = @transform_2, window_bounds = array<i64: 1, 128>}, {transform_indices = @transform_3, window_bounds = array<i64: 256, 128>}]} {
    %c0 = arith.constant 0 : index
    %c0_0 = arith.constant 0 : index
    %0 = vector.load %arg1[%c0, %c0_0] : memref<256x256xbf16, #tpu.memory_space<vmem>>, vector<256x256xbf16>
    %c0_1 = arith.constant 0 : index
    %c0_2 = arith.constant 0 : index
    %1 = vector.load %arg2[%c0_1, %c0_2] : memref<256x128xbf16, #tpu.memory_space<vmem>>, vector<256x128xbf16>
    %cst = arith.constant dense<0.000000e+00> : vector<256x128xf32>
    %2 = tpu.matmul %0, %1, %cst {dimension_numbers = #tpu.dot_dimension_numbers<[1], [0], [0], [1], [0, 0, 1, 1], [], []>} : vector<256x256xbf16>, vector<256x128xbf16>, vector<256x128xf32> -> vector<256x128xf32>
    %c0_3 = arith.constant 0 : index
    %c0_4 = arith.constant 0 : index
    %3 = vector.load %arg3[%c0_3, %c0_4] : memref<1x128xf32, #tpu.memory_space<vmem>>, vector<1x128xf32>
    %4 = vector.broadcast %3 : vector<1x128xf32> to vector<256x128xf32>
    %5 = arith.addf %2, %4 : vector<256x128xf32>
    %cst_5 = arith.constant 0.000000e+00 : f32
    %6 = vector.broadcast %cst_5 : f32 to vector<256x128xf32>
    %7 = arith.maximumf %5, %6 : vector<256x128xf32>
    %8 = arith.truncf %7 : vector<256x128xf32> to vector<256x128xbf16>
    %c0_6 = arith.constant 0 : index
    %c0_7 = arith.constant 0 : index
    %9 = vector.load %arg4[%c0_6, %c0_7] : memref<256x128xbf16, #tpu.memory_space<vmem>>, vector<256x128xbf16>
    tpu.vector_store %arg4[%c0_6, %c0_7], %8 {strides = array<i32>} : memref<256x128xbf16, #tpu.memory_space<vmem>>, vector<256x128xbf16>,
    return
  }
  func.func @transform_0(%arg0: i32) -> (i32, i32) {
    %c0_i32 = arith.constant 0 : i32
    %c0_i32_0 = arith.constant 0 : i32
    return %arg0, %c0_i32 : i32, i32
  }
  func.func @transform_1(%arg0: i32) -> (i32, i32) {
    %c0_i32 = arith.constant 0 : i32
    %c0_i32_0 = arith.constant 0 : i32
    %c0_i32_1 = arith.constant 0 : i32
    return %c0_i32, %c0_i32_0 : i32, i32
  }
  func.func @transform_2(%arg0: i32) -> (i32, i32) {
    %c0_i32 = arith.constant 0 : i32
    %c0_i32_0 = arith.constant 0 : i32
    %c0_i32_1 = arith.constant 0 : i32
    return %c0_i32, %c0_i32_0 : i32, i32
  }
  func.func @transform_3(%arg0: i32) -> (i32, i32) {
    %c0_i32 = arith.constant 0 : i32
    %c0_i32_0 = arith.constant 0 : i32
    return %arg0, %c0_i32 : i32, i32
  }
}

module attributes {stable_mosaic.version = 11 : i64} {
  func.func @_matmul_bias_act_kernel(%arg0: i32, %arg1: memref<144x512xbf16, #tpu.memory_space<vmem>>, %arg2: memref<512x128xbf16, #tpu.memory_space<vmem>>, %arg3: memref<1x128xf32, #tpu.memory_space<vmem>>, %arg4: memref<144x128xbf16, #tpu.memory_space<vmem>>) attributes {dimension_semantics = [#tpu.dimension_semantics<parallel>], iteration_bounds = array<i64: 1>, scalar_prefetch = 0 : i64, scratch_operands = 0 : i64, tpu.core_type = #tpu.core_type<tc>, window_params = [{transform_indices = @transform_0, window_bounds = array<i64: 144, 512>}, {pipeline_mode = #tpu.pipeline_mode<synchronous>, transform_indices = @transform_1, window_bounds = array<i64: 512, 128>}, {pipeline_mode = #tpu.pipeline_mode<synchronous>, transform_indices = @transform_2, window_bounds = array<i64: 1, 128>}, {transform_indices = @transform_3, window_bounds = array<i64: 144, 128>}]} {
    %c0 = arith.constant 0 : index
    %c0_0 = arith.constant 0 : index
    %0 = vector.load %arg1[%c0, %c0_0] : memref<144x512xbf16, #tpu.memory_space<vmem>>, vector<144x512xbf16>
    %c0_1 = arith.constant 0 : index
    %c0_2 = arith.constant 0 : index
    %1 = vector.load %arg2[%c0_1, %c0_2] : memref<512x128xbf16, #tpu.memory_space<vmem>>, vector<512x128xbf16>
    %cst = arith.constant dense<0.000000e+00> : vector<144x128xf32>
    %2 = tpu.matmul %0, %1, %cst {dimension_numbers = #tpu.dot_dimension_numbers<[1], [0], [0], [1], [0, 0, 1, 1], [], []>} : vector<144x512xbf16>, vector<512x128xbf16>, vector<144x128xf32> -> vector<144x128xf32>
    %c0_3 = arith.constant 0 : index
    %c0_4 = arith.constant 0 : index
    %3 = vector.load %arg3[%c0_3, %c0_4] : memref<1x128xf32, #tpu.memory_space<vmem>>, vector<1x128xf32>
    %4 = vector.broadcast %3 : vector<1x128xf32> to vector<144x128xf32>
    %5 = arith.addf %2, %4 : vector<144x128xf32>
    %cst_5 = arith.constant 0.000000e+00 : f32
    %6 = vector.broadcast %cst_5 : f32 to vector<144x128xf32>
    %7 = arith.maximumf %5, %6 : vector<144x128xf32>
    %8 = arith.truncf %7 : vector<144x128xf32> to vector<144x128xbf16>
    %c0_6 = arith.constant 0 : index
    %c0_7 = arith.constant 0 : index
    %9 = vector.load %arg4[%c0_6, %c0_7] : memref<144x128xbf16, #tpu.memory_space<vmem>>, vector<144x128xbf16>
    tpu.vector_store %arg4[%c0_6, %c0_7], %8 {strides = array<i32>} : memref<144x128xbf16, #tpu.memory_space<vmem>>, vector<144x128xbf16>,
    return
  }
  func.func @transform_0(%arg0: i32) -> (i32, i32) {
    %c0_i32 = arith.constant 0 : i32
    %c0_i32_0 = arith.constant 0 : i32
    return %arg0, %c0_i32 : i32, i32
  }
  func.func @transform_1(%arg0: i32) -> (i32, i32) {
    %c0_i32 = arith.constant 0 : i32
    %c0_i32_0 = arith.constant 0 : i32
    %c0_i32_1 = arith.constant 0 : i32
    return %c0_i32, %c0_i32_0 : i32, i32
  }
  func.func @transform_2(%arg0: i32) -> (i32, i32) {
    %c0_i32 = arith.constant 0 : i32
    %c0_i32_0 = arith.constant 0 : i32
    %c0_i32_1 = arith.constant 0 : i32
    return %c0_i32, %c0_i32_0 : i32, i32
  }
  func.func @transform_3(%arg0: i32) -> (i32, i32) {
    %c0_i32 = arith.constant 0 : i32
    %c0_i32_0 = arith.constant 0 : i32
    return %arg0, %c0_i32 : i32, i32
  }
}

module attributes {stable_mosaic.version = 11 : i64} {
  func.func @_conv3_proj_kernel(%arg0: i32, %arg1: memref<16x576xbf16, #tpu.memory_space<vmem>>, %arg2: memref<576x64xbf16, #tpu.memory_space<vmem>>, %arg3: memref<1x64xf32, #tpu.memory_space<vmem>>, %arg4: memref<64x512xbf16, #tpu.memory_space<vmem>>, %arg5: memref<1x512xf32, #tpu.memory_space<vmem>>, %arg6: memref<16x512xf32, #tpu.memory_space<vmem>>) attributes {dimension_semantics = [#tpu.dimension_semantics<parallel>], iteration_bounds = array<i64: 1>, scalar_prefetch = 0 : i64, scratch_operands = 0 : i64, tpu.core_type = #tpu.core_type<tc>, window_params = [{transform_indices = @transform_0, window_bounds = array<i64: 16, 576>}, {pipeline_mode = #tpu.pipeline_mode<synchronous>, transform_indices = @transform_1, window_bounds = array<i64: 576, 64>}, {pipeline_mode = #tpu.pipeline_mode<synchronous>, transform_indices = @transform_2, window_bounds = array<i64: 1, 64>}, {pipeline_mode = #tpu.pipeline_mode<synchronous>, transform_indices = @transform_3, window_bounds = array<i64: 64, 512>}, {pipeline_mode = #tpu.pipeline_mode<synchronous>, transform_indices = @transform_4, window_bounds = array<i64: 1, 512>}, {transform_indices = @transform_5, window_bounds = array<i64: 16, 512>}]} {
    %c0 = arith.constant 0 : index
    %c0_0 = arith.constant 0 : index
    %0 = vector.load %arg1[%c0, %c0_0] : memref<16x576xbf16, #tpu.memory_space<vmem>>, vector<16x576xbf16>
    %c0_1 = arith.constant 0 : index
    %c0_2 = arith.constant 0 : index
    %1 = vector.load %arg2[%c0_1, %c0_2] : memref<576x64xbf16, #tpu.memory_space<vmem>>, vector<576x64xbf16>
    %cst = arith.constant dense<0.000000e+00> : vector<16x64xf32>
    %2 = tpu.matmul %0, %1, %cst {dimension_numbers = #tpu.dot_dimension_numbers<[1], [0], [0], [1], [0, 0, 1, 1], [], []>} : vector<16x576xbf16>, vector<576x64xbf16>, vector<16x64xf32> -> vector<16x64xf32>
    %c0_3 = arith.constant 0 : index
    %c0_4 = arith.constant 0 : index
    %3 = vector.load %arg3[%c0_3, %c0_4] : memref<1x64xf32, #tpu.memory_space<vmem>>, vector<1x64xf32>
    %4 = vector.broadcast %3 : vector<1x64xf32> to vector<16x64xf32>
    %5 = arith.addf %2, %4 : vector<16x64xf32>
    %cst_5 = arith.constant 0.000000e+00 : f32
    %6 = vector.broadcast %cst_5 : f32 to vector<16x64xf32>
    %7 = arith.maximumf %5, %6 : vector<16x64xf32>
    %8 = arith.truncf %7 : vector<16x64xf32> to vector<16x64xbf16>
    %c0_6 = arith.constant 0 : index
    %c0_7 = arith.constant 0 : index
    %9 = vector.load %arg4[%c0_6, %c0_7] : memref<64x512xbf16, #tpu.memory_space<vmem>>, vector<64x512xbf16>
    %cst_8 = arith.constant dense<0.000000e+00> : vector<16x512xf32>
    %10 = tpu.matmul %8, %9, %cst_8 {dimension_numbers = #tpu.dot_dimension_numbers<[1], [0], [0], [1], [0, 0, 1, 1], [], []>} : vector<16x64xbf16>, vector<64x512xbf16>, vector<16x512xf32> -> vector<16x512xf32>
    %c0_9 = arith.constant 0 : index
    %c0_10 = arith.constant 0 : index
    %11 = vector.load %arg5[%c0_9, %c0_10] : memref<1x512xf32, #tpu.memory_space<vmem>>, vector<1x512xf32>
    %12 = vector.broadcast %11 : vector<1x512xf32> to vector<16x512xf32>
    %13 = arith.addf %10, %12 : vector<16x512xf32>
    %c0_11 = arith.constant 0 : index
    %c0_12 = arith.constant 0 : index
    %14 = vector.load %arg6[%c0_11, %c0_12] : memref<16x512xf32, #tpu.memory_space<vmem>>, vector<16x512xf32>
    tpu.vector_store %arg6[%c0_11, %c0_12], %13 {strides = array<i32>} : memref<16x512xf32, #tpu.memory_space<vmem>>, vector<16x512xf32>,
    return
  }
  func.func @transform_0(%arg0: i32) -> (i32, i32) {
    %c0_i32 = arith.constant 0 : i32
    %c0_i32_0 = arith.constant 0 : i32
    return %arg0, %c0_i32 : i32, i32
  }
  func.func @transform_1(%arg0: i32) -> (i32, i32) {
    %c0_i32 = arith.constant 0 : i32
    %c0_i32_0 = arith.constant 0 : i32
    %c0_i32_1 = arith.constant 0 : i32
    return %c0_i32, %c0_i32_0 : i32, i32
  }
  func.func @transform_2(%arg0: i32) -> (i32, i32) {
    %c0_i32 = arith.constant 0 : i32
    %c0_i32_0 = arith.constant 0 : i32
    %c0_i32_1 = arith.constant 0 : i32
    return %c0_i32, %c0_i32_0 : i32, i32
  }
  func.func @transform_3(%arg0: i32) -> (i32, i32) {
    %c0_i32 = arith.constant 0 : i32
    %c0_i32_0 = arith.constant 0 : i32
    %c0_i32_1 = arith.constant 0 : i32
    return %c0_i32, %c0_i32_0 : i32, i32
  }
  func.func @transform_4(%arg0: i32) -> (i32, i32) {
    %c0_i32 = arith.constant 0 : i32
    %c0_i32_0 = arith.constant 0 : i32
    %c0_i32_1 = arith.constant 0 : i32
    return %c0_i32, %c0_i32_0 : i32, i32
  }
  func.func @transform_5(%arg0: i32) -> (i32, i32) {
    %c0_i32 = arith.constant 0 : i32
    %c0_i32_0 = arith.constant 0 : i32
    return %arg0, %c0_i32 : i32, i32
  }
}

module attributes {stable_mosaic.version = 11 : i64} {
  func.func @_lstm_step_kernel(%arg0: i32, %arg1: memref<1x8x512xf32, #tpu.memory_space<vmem>>, %arg2: memref<128x512xf32, #tpu.memory_space<vmem>>, %arg3: memref<8x128xf32, #tpu.memory_space<vmem>>, %arg4: memref<8x128xf32, #tpu.memory_space<vmem>>, %arg5: memref<128x128xbf16, #tpu.memory_space<vmem>>, %arg6: memref<1x128xf32, #tpu.memory_space<vmem>>, %arg7: memref<1x8x128xf32, #tpu.memory_space<vmem>>, %arg8: memref<8x128xf32, #tpu.memory_space<vmem>>, %arg9: memref<8x128xf32, #tpu.memory_space<vmem>>) attributes {dimension_semantics = [#tpu.dimension_semantics<arbitrary>], iteration_bounds = array<i64: 8>, scalar_prefetch = 0 : i64, scratch_operands = 0 : i64, tpu.core_type = #tpu.core_type<tc>, window_params = [{transform_indices = @transform_0, window_bounds = array<i64: 1, 8, 512>}, {pipeline_mode = #tpu.pipeline_mode<synchronous>, transform_indices = @transform_1, window_bounds = array<i64: 128, 512>}, {pipeline_mode = #tpu.pipeline_mode<synchronous>, transform_indices = @transform_2, window_bounds = array<i64: 8, 128>}, {pipeline_mode = #tpu.pipeline_mode<synchronous>, transform_indices = @transform_3, window_bounds = array<i64: 8, 128>}, {pipeline_mode = #tpu.pipeline_mode<synchronous>, transform_indices = @transform_4, window_bounds = array<i64: 128, 128>}, {pipeline_mode = #tpu.pipeline_mode<synchronous>, transform_indices = @transform_5, window_bounds = array<i64: 1, 128>}, {transform_indices = @transform_6, window_bounds = array<i64: 1, 8, 128>}, {pipeline_mode = #tpu.pipeline_mode<synchronous>, transform_indices = @transform_7, window_bounds = array<i64: 8, 128>}, {pipeline_mode = #tpu.pipeline_mode<synchronous>, transform_indices = @transform_8, window_bounds = array<i64: 8, 128>}]} {
    %c0_i32 = arith.constant 0 : i32
    %0 = arith.cmpi eq, %arg0, %c0_i32 : i32
    %1 = arith.extui %0 : i1 to i32
    %c0_i32_0 = arith.constant 0 : i32
    %2 = arith.cmpi ne, %1, %c0_i32_0 : i32
    scf.if %2 {
      %c0_24 = arith.constant 0 : index
      %c0_25 = arith.constant 0 : index
      %46 = vector.load %arg3[%c0_24, %c0_25] : memref<8x128xf32, #tpu.memory_space<vmem>>, vector<8x128xf32>
      %c0_26 = arith.constant 0 : index
      %c0_27 = arith.constant 0 : index
      %47 = vector.load %arg8[%c0_26, %c0_27] : memref<8x128xf32, #tpu.memory_space<vmem>>, vector<8x128xf32>
      tpu.vector_store %arg8[%c0_26, %c0_27], %46 {strides = array<i32>} : memref<8x128xf32, #tpu.memory_space<vmem>>, vector<8x128xf32>,
      %c0_28 = arith.constant 0 : index
      %c0_29 = arith.constant 0 : index
      %48 = vector.load %arg4[%c0_28, %c0_29] : memref<8x128xf32, #tpu.memory_space<vmem>>, vector<8x128xf32>
      %c0_30 = arith.constant 0 : index
      %c0_31 = arith.constant 0 : index
      %49 = vector.load %arg9[%c0_30, %c0_31] : memref<8x128xf32, #tpu.memory_space<vmem>>, vector<8x128xf32>
      tpu.vector_store %arg9[%c0_30, %c0_31], %48 {strides = array<i32>} : memref<8x128xf32, #tpu.memory_space<vmem>>, vector<8x128xf32>,
    } else {
    }
    %c0 = arith.constant 0 : index
    %c0_1 = arith.constant 0 : index
    %3 = vector.load %arg8[%c0, %c0_1] : memref<8x128xf32, #tpu.memory_space<vmem>>, vector<8x128xf32>
    %c0_2 = arith.constant 0 : index
    %c0_3 = arith.constant 0 : index
    %4 = vector.load %arg9[%c0_2, %c0_3] : memref<8x128xf32, #tpu.memory_space<vmem>>, vector<8x128xf32>
    %c0_4 = arith.constant 0 : index
    %c0_5 = arith.constant 0 : index
    %c0_6 = arith.constant 0 : index
    %5 = vector.load %arg1[%c0_4, %c0_5, %c0_6] : memref<1x8x512xf32, #tpu.memory_space<vmem>>, vector<1x8x512xf32>
    %6 = vector.shape_cast %5 : vector<1x8x512xf32> to vector<8x512xf32>
    %c0_7 = arith.constant 0 : index
    %c0_8 = arith.constant 0 : index
    %7 = vector.load %arg2[%c0_7, %c0_8] : memref<128x512xf32, #tpu.memory_space<vmem>>, vector<128x512xf32>
    %cst = arith.constant dense<0.000000e+00> : vector<8x512xf32>
    %8 = tpu.matmul %3, %7, %cst {dimension_numbers = #tpu.dot_dimension_numbers<[1], [0], [0], [1], [0, 0, 1, 1], [], []>} : vector<8x128xf32>, vector<128x512xf32>, vector<8x512xf32> -> vector<8x512xf32>
    %9 = arith.addf %6, %8 : vector<8x512xf32>
    %10 = vector.extract_strided_slice %9 {offsets = [0, 0], sizes = [8, 128], strides = [1, 1]} : vector<8x512xf32> to vector<8x128xf32>
    %11 = arith.negf %10 : vector<8x128xf32>
    %12 = math.exp %11 : vector<8x128xf32>
    %cst_9 = arith.constant 1.000000e+00 : f32
    %13 = vector.broadcast %cst_9 : f32 to vector<8x128xf32>
    %14 = arith.addf %13, %12 : vector<8x128xf32>
    %15 = arith.divf %13, %14 : vector<8x128xf32>
    %16 = vector.extract_strided_slice %9 {offsets = [0, 128], sizes = [8, 128], strides = [1, 1]} : vector<8x512xf32> to vector<8x128xf32>
    %17 = arith.negf %16 : vector<8x128xf32>
    %18 = math.exp %17 : vector<8x128xf32>
    %cst_10 = arith.constant 1.000000e+00 : f32
    %19 = vector.broadcast %cst_10 : f32 to vector<8x128xf32>
    %20 = arith.addf %19, %18 : vector<8x128xf32>
    %21 = arith.divf %19, %20 : vector<8x128xf32>
    %22 = vector.extract_strided_slice %9 {offsets = [0, 256], sizes = [8, 128], strides = [1, 1]} : vector<8x512xf32> to vector<8x128xf32>
    %23 = math.tanh %22 : vector<8x128xf32>
    %24 = vector.extract_strided_slice %9 {offsets = [0, 384], sizes = [8, 128], strides = [1, 1]} : vector<8x512xf32> to vector<8x128xf32>
    %25 = arith.negf %24 : vector<8x128xf32>
    %26 = math.exp %25 : vector<8x128xf32>
    %cst_11 = arith.constant 1.000000e+00 : f32
    %27 = vector.broadcast %cst_11 : f32 to vector<8x128xf32>
    %28 = arith.addf %27, %26 : vector<8x128xf32>
    %29 = arith.divf %27, %28 : vector<8x128xf32>
    %30 = arith.mulf %21, %4 : vector<8x128xf32>
    %31 = arith.mulf %15, %23 : vector<8x128xf32>
    %32 = arith.addf %30, %31 : vector<8x128xf32>
    %33 = math.tanh %32 : vector<8x128xf32>
    %34 = arith.mulf %29, %33 : vector<8x128xf32>
    %c0_12 = arith.constant 0 : index
    %c0_13 = arith.constant 0 : index
    %35 = vector.load %arg8[%c0_12, %c0_13] : memref<8x128xf32, #tpu.memory_space<vmem>>, vector<8x128xf32>
    tpu.vector_store %arg8[%c0_12, %c0_13], %34 {strides = array<i32>} : memref<8x128xf32, #tpu.memory_space<vmem>>, vector<8x128xf32>,
    %c0_14 = arith.constant 0 : index
    %c0_15 = arith.constant 0 : index
    %36 = vector.load %arg9[%c0_14, %c0_15] : memref<8x128xf32, #tpu.memory_space<vmem>>, vector<8x128xf32>
    tpu.vector_store %arg9[%c0_14, %c0_15], %32 {strides = array<i32>} : memref<8x128xf32, #tpu.memory_space<vmem>>, vector<8x128xf32>,
    %37 = arith.truncf %34 : vector<8x128xf32> to vector<8x128xbf16>
    %c0_16 = arith.constant 0 : index
    %c0_17 = arith.constant 0 : index
    %38 = vector.load %arg5[%c0_16, %c0_17] : memref<128x128xbf16, #tpu.memory_space<vmem>>, vector<128x128xbf16>
    %cst_18 = arith.constant dense<0.000000e+00> : vector<8x128xf32>
    %39 = tpu.matmul %37, %38, %cst_18 {dimension_numbers = #tpu.dot_dimension_numbers<[1], [0], [0], [1], [0, 0, 1, 1], [], []>} : vector<8x128xbf16>, vector<128x128xbf16>, vector<8x128xf32> -> vector<8x128xf32>
    %c0_19 = arith.constant 0 : index
    %c0_20 = arith.constant 0 : index
    %40 = vector.load %arg6[%c0_19, %c0_20] : memref<1x128xf32, #tpu.memory_space<vmem>>, vector<1x128xf32>
    %41 = vector.broadcast %40 : vector<1x128xf32> to vector<8x128xf32>
    %42 = arith.addf %39, %41 : vector<8x128xf32>
    %c0_21 = arith.constant 0 : index
    %c0_22 = arith.constant 0 : index
    %c0_23 = arith.constant 0 : index
    %43 = vector.load %arg7[%c0_21, %c0_22, %c0_23] : memref<1x8x128xf32, #tpu.memory_space<vmem>>, vector<1x8x128xf32>
    %44 = vector.shape_cast %43 : vector<1x8x128xf32> to vector<8x128xf32>
    %45 = vector.shape_cast %42 : vector<8x128xf32> to vector<1x8x128xf32>
    tpu.vector_store %arg7[%c0_21, %c0_22, %c0_23], %45 {strides = array<i32>} : memref<1x8x128xf32, #tpu.memory_space<vmem>>, vector<1x8x128xf32>,
    return
  }
  func.func @transform_0(%arg0: i32) -> (i32, i32, i32) {
    %c0_i32 = arith.constant 0 : i32
    %c0_i32_0 = arith.constant 0 : i32
    %c0_i32_1 = arith.constant 0 : i32
    return %arg0, %c0_i32, %c0_i32_0 : i32, i32, i32
  }
  func.func @transform_1(%arg0: i32) -> (i32, i32) {
    %c0_i32 = arith.constant 0 : i32
    %c0_i32_0 = arith.constant 0 : i32
    %c0_i32_1 = arith.constant 0 : i32
    return %c0_i32, %c0_i32_0 : i32, i32
  }
  func.func @transform_2(%arg0: i32) -> (i32, i32) {
    %c0_i32 = arith.constant 0 : i32
    %c0_i32_0 = arith.constant 0 : i32
    %c0_i32_1 = arith.constant 0 : i32
    return %c0_i32, %c0_i32_0 : i32, i32
  }
  func.func @transform_3(%arg0: i32) -> (i32, i32) {
    %c0_i32 = arith.constant 0 : i32
    %c0_i32_0 = arith.constant 0 : i32
    %c0_i32_1 = arith.constant 0 : i32
    return %c0_i32, %c0_i32_0 : i32, i32
  }
  func.func @transform_4(%arg0: i32) -> (i32, i32) {
    %c0_i32 = arith.constant 0 : i32
    %c0_i32_0 = arith.constant 0 : i32
    %c0_i32_1 = arith.constant 0 : i32
    return %c0_i32, %c0_i32_0 : i32, i32
  }
  func.func @transform_5(%arg0: i32) -> (i32, i32) {
    %c0_i32 = arith.constant 0 : i32
    %c0_i32_0 = arith.constant 0 : i32
    %c0_i32_1 = arith.constant 0 : i32
    return %c0_i32, %c0_i32_0 : i32, i32
  }
  func.func @transform_6(%arg0: i32) -> (i32, i32, i32) {
    %c0_i32 = arith.constant 0 : i32
    %c0_i32_0 = arith.constant 0 : i32
    %c0_i32_1 = arith.constant 0 : i32
    return %arg0, %c0_i32, %c0_i32_0 : i32, i32, i32
  }
  func.func @transform_7(%arg0: i32) -> (i32, i32) {
    %c0_i32 = arith.constant 0 : i32
    %c0_i32_0 = arith.constant 0 : i32
    %c0_i32_1 = arith.constant 0 : i32
    return %c0_i32, %c0_i32_0 : i32, i32
  }
  func.func @transform_8(%arg0: i32) -> (i32, i32) {
    %c0_i32 = arith.constant 0 : i32
    %c0_i32_0 = arith.constant 0 : i32
    %c0_i32_1 = arith.constant 0 : i32
    return %c0_i32, %c0_i32_0 : i32, i32
  }
}

</mosaic_0001>

<bundles_post_ra>
// kernel: ppo_forward.4
= control target key start
LH: loop header
LB: loop body
LE: loop exit
PB: predicated region body
PF: predicated region fallthrough
CT: control target
= control target key end

     0   :  { %s1363_s12 = smov 0   ;;  %s1521_s0 = inlined_call_operand.vmem [shape: bf16[1024,256], index: 0, kind: input, shape index: {}]   ;;  %s1522_s1 = inlined_call_operand.vmem [shape: bf16[256,128], index: 1, kind: input, shape index: {}]   ;;  %s1523_s2 = inlined_call_operand.vmem [shape: f32[1,128], index: 2, kind: input, shape index: {}]   ;;  %s1524_s3 = inlined_call_operand.vmem [shape: bf16[1024,128], index: 3, kind: output, shape index: {}]  }
   0x1 LB: > { %s914_s13 = sadd.s32 4294967295, %s1341_s12   ;;  %p918_p0 = scmp.ge.s32.totalorder %s1341_s12, 1  ;;  %s1341_s12 = sphi %s1363_s12, %s13_s12  }
   0x2   : > { %p139_p1 = scmp.lt.s32.totalorder %s1341_s12, 5 }
   0x4   : > { %p140_p2 = pnand %p918_p0, %p139_p1 }
   0x5   : > { %v1271_v0 = vld [vmem:[%s1522_s1 + $0x40] sm:$0xff] (!%p140_p2)   ;;  %s919_s16 = sshll.u32 (!%p140_p2), %s914_s13, 5  ;;  %v1273_v2 = vld [vmem:[%s1522_s1 + $0x48] sm:$0xff] (!%p140_p2)   ;;  %v1275_v4 = vld [vmem:[%s1522_s1 + $0x50] sm:$0xff] (!%p140_p2)  }
   0x6   : > { %143 = sbr.rel (%p140_p2) target bundleno = 319 (0x13f), region = 32  ;;  %v1272_v1 = vld [vmem:[%s1522_s1] sm:$0xff] (!%p140_p2)   ;;  %1135 = vmatprep.subr.bf16.mxu0 (!%p140_p2), %v1271_v0  ;;  %1247 = vmatprep.subr.bf16.mxu1 (!%p140_p2), %v1271_v0  ;;  %v1274_v3 = vld [vmem:[%s1522_s1 + $0x8] sm:$0xff] (!%p140_p2)   ;;  %p165_p3 = scmp.lt.s32.totalorder (!%p140_p2), %s919_s16, 127  ;;  %v1276_v5 = vld [vmem:[%s1522_s1 + $0x10] sm:$0xff] (!%p140_p2)  }
   0x7   : > { %1136 = vmatpush3.bf16.msra.mxu0 (!%p140_p2), %v1272_v1  ;;  %1255 = vmatpush3.bf16.msra.mxu1 (!%p140_p2), %v1272_v1  ;;  %v1277_v6 = vld [vmem:[%s1522_s1 + $0x58] sm:$0xff] (!%p140_p2)   ;;  %v1279_v8 = vld [vmem:[%s1522_s1 + $0x60] sm:$0xff] (!%p140_p2)   ;;  %v1281_v10 = vld [vmem:[%s1522_s1 + $0x68] sm:$0xff] (!%p140_p2)  }
   0x8   : > { %1137 = vmatprep.subr.bf16.mxu0 (!%p140_p2), %v1273_v2  ;;  %1248 = vmatprep.subr.bf16.mxu1 (!%p140_p2), %v1273_v2  ;;  %v1278_v7 = vld [vmem:[%s1522_s1 + $0x18] sm:$0xff] (!%p140_p2)   ;;  %v1280_v9 = vld [vmem:[%s1522_s1 + $0x20] sm:$0xff] (!%p140_p2)   ;;  %v1282_v13 = vld [vmem:[%s1522_s1 + $0x28] sm:$0xff] (!%p140_p2)  }
   0x9   : > { %v1283_v14 = vld [vmem:[%s1522_s1 + $0x70] sm:$0xff] (!%p140_p2)   ;;  %v1285_v16 = vld [vmem:[%s1522_s1 + $0x78] sm:$0xff] (!%p140_p2)   ;;  %v1462_v50 = vld [vmem:[%s1523_s2] ss:$0 sm:$0xff] (!%p140_p2) }
   0xa   : > { %v1284_v15 = vld [vmem:[%s1522_s1 + $0x30] sm:$0xff] (!%p140_p2)   ;;  %v1286_v17 = vld [vmem:[%s1522_s1 + $0x38] sm:$0xff] (!%p140_p2)  }
   0xb   : > { %1138 = vmatpush3.bf16.msra.mxu0 (!%p140_p2), %v1274_v3  ;;  %1256 = vmatpush3.bf16.msra.mxu1 (!%p140_p2), %v1274_v3 }
   0xc   : > { %1139 = vmatprep.subr.bf16.mxu0 (!%p140_p2), %v1275_v4  ;;  %1249 = vmatprep.subr.bf16.mxu1 (!%p140_p2), %v1275_v4 }
   0xd   : > { %s1526_s16 = smov (!%p165_p3, %s919_s16), 127 }
   0xe   : > { %s1007_s4 = sshll.u32 %s1526_s16, 3  ;;  %s923_s28 = sshll.u32 %s1526_s16, 2 }
   0xf   : > { %1140 = vmatpush3.bf16.msra.mxu0 %v1276_v5  ;;  %1257 = vmatpush3.bf16.msra.mxu1 %v1276_v5  ;;  %s1404_s9 = scalar_lea.vmem %s1521_s0, %s1007_s4  ;;  %s1472_s4 = scalar_lea.vmem %s1524_s3, %s923_s28 }
  0x10   : > { %1141 = vmatprep.subr.bf16.mxu0 %v1277_v6  ;;  %1250 = vmatprep.subr.bf16.mxu1 %v1277_v6  ;;  %v1289_v11 = vld [vmem:[%s1404_s9 + $0x4] ss:$8 sps:$4 sm:$0xff]   ;;  %v1287_v18 = vld [vmem:[%s1404_s9] ss:$8 sps:$4 sm:$0xff]   ;;  %v1293_v20 = vld [vmem:[%s1404_s9 + $0x14] ss:$8 sps:$4 sm:$0xff]  }
  0x11   : > { %v1292_v12 = vld [vmem:[%s1404_s9 + $0x84] ss:$8 sps:$4 sm:$0xff]   ;;  %537 = vmatprep.mubr.bf16.mxu0 %v1289_v11  ;;  %v1290_v19 = vld [vmem:[%s1404_s9 + $0x80] ss:$8 sps:$4 sm:$0xff]   ;;  %v1295_v21 = vld [vmem:[%s1404_s9 + $0x94] ss:$8 sps:$4 sm:$0xff]  }
  0x12   : > { %601 = vmatprep.mubr.bf16.mxu1 %v1292_v12  ;;  %v1297_v22 = vld [vmem:[%s1404_s9 + $0x10] ss:$8 sps:$4 sm:$0xff]   ;;  %v1299_v24 = vld [vmem:[%s1404_s9 + $0x24] ss:$8 sps:$4 sm:$0xff]   ;;  %v1303_v26 = vld [vmem:[%s1404_s9 + $0x20] ss:$8 sps:$4 sm:$0xff]  }
  0x13   : > { %1142 = vmatpush3.bf16.msra.mxu0 %v1278_v7  ;;  %1258 = vmatpush3.bf16.msra.mxu1 %v1278_v7  ;;  %v1298_v23 = vld [vmem:[%s1404_s9 + $0x90] ss:$8 sps:$4 sm:$0xff]   ;;  %v1301_v25 = vld [vmem:[%s1404_s9 + $0xa4] ss:$8 sps:$4 sm:$0xff]   ;;  %v1304_v27 = vld [vmem:[%s1404_s9 + $0xa0] ss:$8 sps:$4 sm:$0xff]  }
  0x14   : > { %1143 = vmatprep.subr.bf16.mxu0 %v1279_v8  ;;  %1251 = vmatprep.subr.bf16.mxu1 %v1279_v8  ;;  %v1305_v28 = vld [vmem:[%s1404_s9 + $0x34] ss:$8 sps:$4 sm:$0xff]   ;;  %v1309_v30 = vld [vmem:[%s1404_s9 + $0x30] ss:$8 sps:$4 sm:$0xff]   ;;  %v1311_v32 = vld [vmem:[%s1404_s9 + $0x44] ss:$8 sps:$4 sm:$0xff]  }
  0x15   : > { %v1307_v29 = vld [vmem:[%s1404_s9 + $0xb4] ss:$8 sps:$4 sm:$0xff]   ;;  %v1310_v31 = vld [vmem:[%s1404_s9 + $0xb0] ss:$8 sps:$4 sm:$0xff]   ;;  %v1313_v33 = vld [vmem:[%s1404_s9 + $0xc4] ss:$8 sps:$4 sm:$0xff]  }
  0x16   : > { %v1315_v34 = vld [vmem:[%s1404_s9 + $0x40] ss:$8 sps:$4 sm:$0xff]   ;;  %v1317_v36 = vld [vmem:[%s1404_s9 + $0x54] ss:$8 sps:$4 sm:$0xff]   ;;  %v1321_v38 = vld [vmem:[%s1404_s9 + $0x50] ss:$8 sps:$4 sm:$0xff]  }
  0x17   : > { %1144 = vmatpush3.bf16.msra.mxu0 %v1280_v9  ;;  %1259 = vmatpush3.bf16.msra.mxu1 %v1280_v9  ;;  %v1316_v35 = vld [vmem:[%s1404_s9 + $0xc0] ss:$8 sps:$4 sm:$0xff]   ;;  %v1319_v37 = vld [vmem:[%s1404_s9 + $0xd4] ss:$8 sps:$4 sm:$0xff]   ;;  %v1322_v39 = vld [vmem:[%s1404_s9 + $0xd0] ss:$8 sps:$4 sm:$0xff]  }
  0x18   : > { %1145 = vmatprep.subr.bf16.mxu0 %v1281_v10  ;;  %1252 = vmatprep.subr.bf16.mxu1 %v1281_v10  ;;  %v1323_v40 = vld [vmem:[%s1404_s9 + $0x64] ss:$8 sps:$4 sm:$0xff]   ;;  %v1327_v42 = vld [vmem:[%s1404_s9 + $0x60] ss:$8 sps:$4 sm:$0xff]   ;;  %v1329_v44 = vld [vmem:[%s1404_s9 + $0x74] ss:$8 sps:$4 sm:$0xff]  }
  0x19   : > { %v1325_v41 = vld [vmem:[%s1404_s9 + $0xe4] ss:$8 sps:$4 sm:$0xff]   ;;  %v1328_v43 = vld [vmem:[%s1404_s9 + $0xe0] ss:$8 sps:$4 sm:$0xff]   ;;  %v1331_v45 = vld [vmem:[%s1404_s9 + $0xf4] ss:$8 sps:$4 sm:$0xff]  }
  0x1a   : > { %v1333_v46 = vld [vmem:[%s1404_s9 + $0x70] ss:$8 sps:$4 sm:$0xff]  }
  0x1b   : > { %1146 = vmatpush3.bf16.msra.mxu0 %v1282_v13  ;;  %1260 = vmatpush3.bf16.msra.mxu1 %v1282_v13  ;;  %v1334_v47 = vld [vmem:[%s1404_s9 + $0xf0] ss:$8 sps:$4 sm:$0xff]  }
  0x1c   : > { %1147 = vmatprep.subr.bf16.mxu0 %v1283_v14  ;;  %1253 = vmatprep.subr.bf16.mxu1 %v1283_v14 }
  0x1f   : > { %1148 = vmatpush3.bf16.msra.mxu0 %v1284_v15  ;;  %1261 = vmatpush3.bf16.msra.mxu1 %v1284_v15 }
  0x20   : > { %1149 = vmatprep.subr.bf16.mxu0 %v1285_v16  ;;  %1254 = vmatprep.subr.bf16.mxu1 %v1285_v16 }
  0x23   : > { %1150 = vmatpush3.bf16.msra.mxu0 %v1286_v17  ;;  %1262 = vmatpush3.bf16.msra.mxu1 %v1286_v17 }
  0x26   : > { %538 = vmatmul.mubr.bf16.vlgmr.msra.gmra.mrb[0].mxu0 %v1287_v18  ;;  %602 = vmatmul.mubr.bf16.vlgmr.msra.gmra.mrb[0].mxu1 %v1290_v19 }
  0x27   : > { %545 = vmatprep.mubr.bf16.mxu0 %v1293_v20  ;;  %609 = vmatprep.mubr.bf16.mxu1 %v1295_v21 }
  0x2e   : > { %546 = vmatmul.mubr.bf16.gmra.mrb[4].mxu0 %v1297_v22  ;;  %610 = vmatmul.mubr.bf16.gmra.mrb[4].mxu1 %v1298_v23 }
  0x2f   : > { %553 = vmatprep.mubr.bf16.mxu0 %v1299_v24  ;;  %617 = vmatprep.mubr.bf16.mxu1 %v1301_v25 }
  0x36   : > { %554 = vmatmul.mubr.bf16.gmra.mrb[8].mxu0 %v1303_v26  ;;  %618 = vmatmul.mubr.bf16.gmra.mrb[8].mxu1 %v1304_v27 }
  0x37   : > { %561 = vmatprep.mubr.bf16.mxu0 %v1305_v28  ;;  %625 = vmatprep.mubr.bf16.mxu1 %v1307_v29 }
  0x3e   : > { %562 = vmatmul.mubr.bf16.gmra.mrb[12].mxu0 %v1309_v30  ;;  %626 = vmatmul.mubr.bf16.gmra.mrb[12].mxu1 %v1310_v31 }
  0x3f   : > { %569 = vmatprep.mubr.bf16.mxu0 %v1311_v32  ;;  %633 = vmatprep.mubr.bf16.mxu1 %v1313_v33 }
  0x46   : > { %570 = vmatmul.mubr.bf16.gmra.mrb[16].mxu0 %v1315_v34  ;;  %634 = vmatmul.mubr.bf16.gmra.mrb[16].mxu1 %v1316_v35 }
  0x47   : > { %577 = vmatprep.mubr.bf16.mxu0 %v1317_v36  ;;  %641 = vmatprep.mubr.bf16.mxu1 %v1319_v37 }
  0x4e   : > { %578 = vmatmul.mubr.bf16.gmra.mrb[20].mxu0 %v1321_v38  ;;  %642 = vmatmul.mubr.bf16.gmra.mrb[20].mxu1 %v1322_v39 }
  0x4f   : > { %585 = vmatprep.mubr.bf16.mxu0 %v1323_v40  ;;  %649 = vmatprep.mubr.bf16.mxu1 %v1325_v41 }
  0x56   : > { %586 = vmatmul.mubr.bf16.gmra.mrb[24].mxu0 %v1327_v42  ;;  %650 = vmatmul.mubr.bf16.gmra.mrb[24].mxu1 %v1328_v43 }
  0x57   : > { %593 = vmatprep.mubr.bf16.mxu0 %v1329_v44  ;;  %657 = vmatprep.mubr.bf16.mxu1 %v1331_v45 }
  0x5e   : > { %594 = vmatmul.mubr.bf16.gmra.mrb[28].mxu0 %v1333_v46  ;;  %658 = vmatmul.mubr.bf16.gmra.mrb[28].mxu1 %v1334_v47 }
  0xf9   : > { %v1151_v48 = vpop.f32.mrb[0].mxu0  ;;  %v1199_v49 = vpop.f32.mrb[0].mxu1 }
  0xfa   : > { %v1152_v51 = vpop.f32.mrb[1].mxu0  ;;  %v1200_v52 = vpop.f32.mrb[1].mxu1 }
  0xfb   : > { %v1153_v53 = vadd.f32 %v1152_v51, %v1151_v48  ;;  %v1201_v54 = vadd.f32 %v1200_v52, %v1199_v49  ;;  %v1154_v55 = vpop.f32.mrb[2].mxu0  ;;  %v1202_v56 = vpop.f32.mrb[2].mxu1 }
  0xfc   : > { %v1155_v57 = vpop.f32.mrb[3].mxu0  ;;  %v1203_v58 = vpop.f32.mrb[3].mxu1 }
  0xfd   : > { %v540_v59 = vadd.f32 %v1153_v53, %v1462_v50  ;;  %v604_v60 = vadd.f32 %v1201_v54, %v1462_v50  ;;  %v1156_v61 = vadd.f32 %v1155_v57, %v1154_v55  ;;  %v1204_v62 = vadd.f32 %v1203_v58, %v1202_v56 }
  0xff   : > { %v543_v63 = vadd.f32 %v1156_v61, %v1462_v50  ;;  %v607_v0 = vadd.f32 %v1204_v62, %v1462_v50  ;;  %v666_v1 = vmax.f32 %v540_v59, 0.0  ;;  %v682_v2 = vmax.f32 %v604_v60, 0.0 }
 0x101   : > { %v667_v3 = vmax.f32 %v543_v63, 0.0  ;;  %v683_v4 = vmax.f32 %v607_v0, 0.0  ;;  %v1157_v5 = vpop.f32.mrb[4].mxu0  ;;  %v1205_v6 = vpop.f32.mrb[4].mxu1 }
 0x102   : > { %v1158_v7 = vpop.f32.mrb[5].mxu0  ;;  %v1206_v8 = vpop.f32.mrb[5].mxu1 }
 0x103   : > { %v1043_v9 = vpack.c.bf16 %v667_v3, %v666_v1  ;;  %v1083_v10 = vpack.c.bf16 %v683_v4, %v682_v2  ;;  %v1159_v11 = vadd.f32 %v1158_v7, %v1157_v5  ;;  %v1207_v12 = vadd.f32 %v1206_v8, %v1205_v6  ;;  %v1160_v13 = vpop.f32.mrb[6].mxu0  ;;  %v1208_v14 = vpop.f32.mrb[6].mxu1 }
 0x104   : > { %v1161_v15 = vpop.f32.mrb[7].mxu0  ;;  %v1209_v16 = vpop.f32.mrb[7].mxu1 }
 0x105   : > { %1044 = vst [vmem:[%s1472_s4] sm:$0xff] %v1043_v9   ;;  %1127 = vst [vmem:[%s1472_s4 + $0x40] sm:$0xff] %v1083_v10   ;;  %v548_v17 = vadd.f32 %v1159_v11, %v1462_v50  ;;  %v612_v18 = vadd.f32 %v1207_v12, %v1462_v50  ;;  %v1162_v19 = vadd.f32 %v1161_v15, %v1160_v13 }
 0x106   : > { %v1210_v20 = vadd.f32 %v1209_v16, %v1208_v14 }
 0x107   : > { %v551_v21 = vadd.f32 %v1162_v19, %v1462_v50  ;;  %v668_v23 = vmax.f32 %v548_v17, 0.0  ;;  %v684_v24 = vmax.f32 %v612_v18, 0.0 }
 0x108   : > { %v615_v22 = vadd.f32 %v1210_v20, %v1462_v50 }
 0x109   : > { %v669_v25 = vmax.f32 %v551_v21, 0.0  ;;  %v1163_v27 = vpop.f32.mrb[8].mxu0  ;;  %v1211_v28 = vpop.f32.mrb[8].mxu1 }
 0x10a   : > { %v685_v26 = vmax.f32 %v615_v22, 0.0  ;;  %v1164_v29 = vpop.f32.mrb[9].mxu0  ;;  %v1212_v30 = vpop.f32.mrb[9].mxu1 }
 0x10b   : > { %v1048_v31 = vpack.c.bf16 %v669_v25, %v668_v23  ;;  %v1165_v33 = vadd.f32 %v1164_v29, %v1163_v27  ;;  %v1213_v34 = vadd.f32 %v1212_v30, %v1211_v28  ;;  %v1166_v35 = vpop.f32.mrb[10].mxu0  ;;  %v1214_v36 = vpop.f32.mrb[10].mxu1 }
 0x10c   : > { %v1088_v32 = vpack.c.bf16 %v685_v26, %v684_v24  ;;  %v1167_v37 = vpop.f32.mrb[11].mxu0  ;;  %v1215_v38 = vpop.f32.mrb[11].mxu1 }
 0x10d   : > { %1120 = vst [vmem:[%s1472_s4 + $0x8] sm:$0xff] %v1048_v31   ;;  %v556_v39 = vadd.f32 %v1165_v33, %v1462_v50  ;;  %v620_v40 = vadd.f32 %v1213_v34, %v1462_v50  ;;  %v1168_v41 = vadd.f32 %v1167_v37, %v1166_v35  ;;  %v1216_v42 = vadd.f32 %v1215_v38, %v1214_v36 }
 0x10e   : > { %1128 = vst [vmem:[%s1472_s4 + $0x48] sm:$0xff] %v1088_v32  }
 0x10f   : > { %v559_v43 = vadd.f32 %v1168_v41, %v1462_v50  ;;  %v623_v44 = vadd.f32 %v1216_v42, %v1462_v50  ;;  %v670_v45 = vmax.f32 %v556_v39, 0.0  ;;  %v686_v46 = vmax.f32 %v620_v40, 0.0 }
 0x111   : > { %v671_v47 = vmax.f32 %v559_v43, 0.0  ;;  %v687_v48 = vmax.f32 %v623_v44, 0.0  ;;  %v1169_v49 = vpop.f32.mrb[12].mxu0  ;;  %v1217_v51 = vpop.f32.mrb[12].mxu1 }
 0x112   : > { %v1170_v52 = vpop.f32.mrb[13].mxu0  ;;  %v1218_v53 = vpop.f32.mrb[13].mxu1 }
 0x113   : > { %v1053_v54 = vpack.c.bf16 %v671_v47, %v670_v45  ;;  %v1093_v55 = vpack.c.bf16 %v687_v48, %v686_v46  ;;  %v1171_v56 = vadd.f32 %v1170_v52, %v1169_v49  ;;  %v1219_v57 = vadd.f32 %v1218_v53, %v1217_v51  ;;  %v1172_v58 = vpop.f32.mrb[14].mxu0  ;;  %v1220_v59 = vpop.f32.mrb[14].mxu1 }
 0x114   : > { %v1173_v60 = vpop.f32.mrb[15].mxu0  ;;  %v1221_v61 = vpop.f32.mrb[15].mxu1 }
 0x115   : > { %1121 = vst [vmem:[%s1472_s4 + $0x10] sm:$0xff] %v1053_v54   ;;  %1129 = vst [vmem:[%s1472_s4 + $0x50] sm:$0xff] %v1093_v55   ;;  %v564_v62 = vadd.f32 %v1171_v56, %v1462_v50  ;;  %v628_v63 = vadd.f32 %v1219_v57, %v1462_v50  ;;  %v1174_v0 = vadd.f32 %v1173_v60, %v1172_v58 }
 0x116   : > { %v1222_v1 = vadd.f32 %v1221_v61, %v1220_v59 }
 0x117   : > { %v567_v2 = vadd.f32 %v1174_v0, %v1462_v50  ;;  %v672_v4 = vmax.f32 %v564_v62, 0.0  ;;  %v688_v5 = vmax.f32 %v628_v63, 0.0 }
 0x118   : > { %v631_v3 = vadd.f32 %v1222_v1, %v1462_v50 }
 0x119   : > { %v673_v6 = vmax.f32 %v567_v2, 0.0  ;;  %v1175_v8 = vpop.f32.mrb[16].mxu0  ;;  %v1223_v9 = vpop.f32.mrb[16].mxu1 }
 0x11a   : > { %v689_v7 = vmax.f32 %v631_v3, 0.0  ;;  %v1176_v10 = vpop.f32.mrb[17].mxu0  ;;  %v1224_v11 = vpop.f32.mrb[17].mxu1 }
 0x11b   : > { %v1058_v12 = vpack.c.bf16 %v673_v6, %v672_v4  ;;  %v1177_v14 = vadd.f32 %v1176_v10, %v1175_v8  ;;  %v1225_v15 = vadd.f32 %v1224_v11, %v1223_v9  ;;  %v1178_v16 = vpop.f32.mrb[18].mxu0  ;;  %v1226_v17 = vpop.f32.mrb[18].mxu1 }
 0x11c   : > { %v1098_v13 = vpack.c.bf16 %v689_v7, %v688_v5  ;;  %v1179_v18 = vpop.f32.mrb[19].mxu0  ;;  %v1227_v19 = vpop.f32.mrb[19].mxu1 }
 0x11d   : > { %1122 = vst [vmem:[%s1472_s4 + $0x18] sm:$0xff] %v1058_v12   ;;  %v572_v20 = vadd.f32 %v1177_v14, %v1462_v50  ;;  %v636_v21 = vadd.f32 %v1225_v15, %v1462_v50  ;;  %v1180_v22 = vadd.f32 %v1179_v18, %v1178_v16  ;;  %v1228_v23 = vadd.f32 %v1227_v19, %v1226_v17 }
 0x11e   : > { %1130 = vst [vmem:[%s1472_s4 + $0x58] sm:$0xff] %v1098_v13  }
 0x11f   : > { %v575_v24 = vadd.f32 %v1180_v22, %v1462_v50  ;;  %v639_v25 = vadd.f32 %v1228_v23, %v1462_v50  ;;  %v674_v26 = vmax.f32 %v572_v20, 0.0  ;;  %v690_v27 = vmax.f32 %v636_v21, 0.0 }
 0x121   : > { %v675_v28 = vmax.f32 %v575_v24, 0.0  ;;  %v691_v29 = vmax.f32 %v639_v25, 0.0  ;;  %v1181_v30 = vpop.f32.mrb[20].mxu0  ;;  %v1229_v31 = vpop.f32.mrb[20].mxu1 }
 0x122   : > { %v1182_v32 = vpop.f32.mrb[21].mxu0  ;;  %v1230_v33 = vpop.f32.mrb[21].mxu1 }
 0x123   : > { %v1063_v34 = vpack.c.bf16 %v675_v28, %v674_v26  ;;  %v1103_v35 = vpack.c.bf16 %v691_v29, %v690_v27  ;;  %v1183_v36 = vadd.f32 %v1182_v32, %v1181_v30  ;;  %v1231_v37 = vadd.f32 %v1230_v33, %v1229_v31  ;;  %v1184_v38 = vpop.f32.mrb[22].mxu0  ;;  %v1232_v39 = vpop.f32.mrb[22].mxu1 }
 0x124   : > { %v1185_v40 = vpop.f32.mrb[23].mxu0  ;;  %v1233_v41 = vpop.f32.mrb[23].mxu1 }
 0x125   : > { %1123 = vst [vmem:[%s1472_s4 + $0x20] sm:$0xff] %v1063_v34   ;;  %1131 = vst [vmem:[%s1472_s4 + $0x60] sm:$0xff] %v1103_v35   ;;  %v580_v42 = vadd.f32 %v1183_v36, %v1462_v50  ;;  %v644_v43 = vadd.f32 %v1231_v37, %v1462_v50  ;;  %v1186_v44 = vadd.f32 %v1185_v40, %v1184_v38 }
 0x126   : > { %v1234_v45 = vadd.f32 %v1233_v41, %v1232_v39 }
 0x127   : > { %v583_v46 = vadd.f32 %v1186_v44, %v1462_v50  ;;  %v676_v48 = vmax.f32 %v580_v42, 0.0  ;;  %v692_v49 = vmax.f32 %v644_v43, 0.0 }
 0x128   : > { %v647_v47 = vadd.f32 %v1234_v45, %v1462_v50 }
 0x129   : > { %v677_v51 = vmax.f32 %v583_v46, 0.0  ;;  %v1187_v53 = vpop.f32.mrb[24].mxu0  ;;  %v1235_v54 = vpop.f32.mrb[24].mxu1 }
 0x12a   : > { %v693_v52 = vmax.f32 %v647_v47, 0.0  ;;  %v1188_v55 = vpop.f32.mrb[25].mxu0  ;;  %v1236_v56 = vpop.f32.mrb[25].mxu1 }
 0x12b   : > { %v1068_v57 = vpack.c.bf16 %v677_v51, %v676_v48  ;;  %v1189_v59 = vadd.f32 %v1188_v55, %v1187_v53  ;;  %v1237_v60 = vadd.f32 %v1236_v56, %v1235_v54  ;;  %v1190_v61 = vpop.f32.mrb[26].mxu0  ;;  %v1238_v62 = vpop.f32.mrb[26].mxu1 }
 0x12c   : > { %v1108_v58 = vpack.c.bf16 %v693_v52, %v692_v49  ;;  %v1191_v63 = vpop.f32.mrb[27].mxu0  ;;  %v1239_v0 = vpop.f32.mrb[27].mxu1 }
 0x12d   : > { %1124 = vst [vmem:[%s1472_s4 + $0x28] sm:$0xff] %v1068_v57   ;;  %v588_v1 = vadd.f32 %v1189_v59, %v1462_v50  ;;  %v652_v2 = vadd.f32 %v1237_v60, %v1462_v50  ;;  %v1192_v3 = vadd.f32 %v1191_v63, %v1190_v61  ;;  %v1240_v4 = vadd.f32 %v1239_v0, %v1238_v62 }
 0x12e   : > { %1132 = vst [vmem:[%s1472_s4 + $0x68] sm:$0xff] %v1108_v58  }
 0x12f   : > { %v591_v5 = vadd.f32 %v1192_v3, %v1462_v50  ;;  %v655_v6 = vadd.f32 %v1240_v4, %v1462_v50  ;;  %v678_v7 = vmax.f32 %v588_v1, 0.0  ;;  %v694_v8 = vmax.f32 %v652_v2, 0.0 }
 0x131   : > { %v679_v9 = vmax.f32 %v591_v5, 0.0  ;;  %v695_v10 = vmax.f32 %v655_v6, 0.0  ;;  %v1193_v11 = vpop.f32.mrb[28].mxu0  ;;  %v1241_v12 = vpop.f32.mrb[28].mxu1 }
 0x132   : > { %v1194_v13 = vpop.f32.mrb[29].mxu0  ;;  %v1242_v14 = vpop.f32.mrb[29].mxu1 }
 0x133   : > { %v1073_v15 = vpack.c.bf16 %v679_v9, %v678_v7  ;;  %v1113_v16 = vpack.c.bf16 %v695_v10, %v694_v8  ;;  %v1195_v17 = vadd.f32 %v1194_v13, %v1193_v11  ;;  %v1243_v18 = vadd.f32 %v1242_v14, %v1241_v12  ;;  %v1196_v19 = vpop.f32.mrb[30].mxu0  ;;  %v1244_v20 = vpop.f32.mrb[30].mxu1 }
 0x134   : > { %v1197_v21 = vpop.f32.mrb[31].mxu0  ;;  %v1245_v22 = vpop.f32.mrb[31].mxu1 }
 0x135   : > { %1125 = vst [vmem:[%s1472_s4 + $0x30] sm:$0xff] %v1073_v15   ;;  %1133 = vst [vmem:[%s1472_s4 + $0x70] sm:$0xff] %v1113_v16   ;;  %v596_v23 = vadd.f32 %v1195_v17, %v1462_v50  ;;  %v660_v24 = vadd.f32 %v1243_v18, %v1462_v50  ;;  %v1198_v25 = vadd.f32 %v1197_v21, %v1196_v19 }
 0x136   : > { %v1246_v26 = vadd.f32 %v1245_v22, %v1244_v20 }
 0x137   : > { %v599_v27 = vadd.f32 %v1198_v25, %v1462_v50  ;;  %v680_v29 = vmax.f32 %v596_v23, 0.0  ;;  %v696_v30 = vmax.f32 %v660_v24, 0.0 }
 0x138   : > { %v663_v28 = vadd.f32 %v1246_v26, %v1462_v50 }
 0x139   : > { %v681_v31 = vmax.f32 %v599_v27, 0.0 }
 0x13a   : > { %v697_v32 = vmax.f32 %v663_v28, 0.0 }
 0x13b   : > { %v1078_v33 = vpack.c.bf16 %v681_v31, %v680_v29 }
 0x13c   : > { %v1118_v34 = vpack.c.bf16 %v697_v32, %v696_v30 }
 0x13d   : > { %1126 = vst [vmem:[%s1472_s4 + $0x38] sm:$0xff] %v1078_v33  }
 0x13e   : > { %1134 = vst [vmem:[%s1472_s4 + $0x78] sm:$0xff] %v1118_v34  }
 0x13f PF: > { %s13_s12 = sadd.s32 1, %s1341_s12  }
 0x140   : > { %p10_p4 = scmp.ge.s32.totalorder %s13_s12, 6  }
 0x142   :  { %12 = sbr.rel (!%p10_p4) target bundleno = 1 (0x1), region = 62 }

// kernel: ppo_forward.5
= control target key start
LH: loop header
LB: loop body
LE: loop exit
PB: predicated region body
PF: predicated region fallthrough
CT: control target
= control target key end

     0   :  { %s1474_s1 = inlined_call_operand.vmem [shape: bf16[512,128], index: 1, kind: input, shape index: {}]   ;;  %s1475_s0 = inlined_call_operand.vmem [shape: bf16[144,512], index: 0, kind: input, shape index: {}]   ;;  %s1476_s2 = inlined_call_operand.vmem [shape: f32[1,128], index: 2, kind: input, shape index: {}]   ;;  %s1477_s3 = inlined_call_operand.vmem [shape: bf16[144,128], index: 3, kind: output, shape index: {}]  }
   0x1   :  { %v1114_v0 = vld [vmem:[%s1474_s1 + $0x40] sm:$0xff]   ;;  %v1118_v4 = vld [vmem:[%s1474_s1 + $0x48] sm:$0xff]   ;;  %v1122_v8 = vld [vmem:[%s1474_s1 + $0x50] sm:$0xff]  }
   0x2   :  { %v1115_v1 = vld [vmem:[%s1474_s1 + $0xc0] sm:$0xff]   ;;  %974 = vmatprep.subr.bf16.mxu0 %v1114_v0  ;;  %v1119_v5 = vld [vmem:[%s1474_s1 + $0xc8] sm:$0xff]   ;;  %v1123_v9 = vld [vmem:[%s1474_s1 + $0xd0] sm:$0xff]  }
   0x3   :  { %v1116_v2 = vld [vmem:[%s1474_s1] sm:$0xff]   ;;  %1044 = vmatprep.subr.bf16.mxu1 %v1115_v1  ;;  %v1120_v6 = vld [vmem:[%s1474_s1 + $0x8] sm:$0xff]   ;;  %v1124_v10 = vld [vmem:[%s1474_s1 + $0x10] sm:$0xff]  }
   0x4   :  { %v1117_v3 = vld [vmem:[%s1474_s1 + $0x80] sm:$0xff]   ;;  %975 = vmatpush3.bf16.msra.mxu0 %v1116_v2  ;;  %v1121_v7 = vld [vmem:[%s1474_s1 + $0x88] sm:$0xff]   ;;  %v1125_v11 = vld [vmem:[%s1474_s1 + $0x90] sm:$0xff]  }
   0x5   :  { %1045 = vmatpush3.bf16.msra.mxu1 %v1117_v3  ;;  %976 = vmatprep.subr.bf16.mxu0 %v1118_v4  ;;  %v1126_v12 = vld [vmem:[%s1474_s1 + $0x58] sm:$0xff]   ;;  %v1130_v16 = vld [vmem:[%s1474_s1 + $0x60] sm:$0xff]   ;;  %v1134_v20 = vld [vmem:[%s1474_s1 + $0x68] sm:$0xff]  }
   0x6   :  { %1046 = vmatprep.subr.bf16.mxu1 %v1119_v5  ;;  %v1127_v13 = vld [vmem:[%s1474_s1 + $0xd8] sm:$0xff]   ;;  %v1131_v17 = vld [vmem:[%s1474_s1 + $0xe0] sm:$0xff]   ;;  %v1135_v21 = vld [vmem:[%s1474_s1 + $0xe8] sm:$0xff]  }
   0x7   :  { %v1128_v14 = vld [vmem:[%s1474_s1 + $0x18] sm:$0xff]   ;;  %v1132_v18 = vld [vmem:[%s1474_s1 + $0x20] sm:$0xff]   ;;  %v1136_v22 = vld [vmem:[%s1474_s1 + $0x28] sm:$0xff]  }
   0x8   :  { %977 = vmatpush3.bf16.msra.mxu0 %v1120_v6  ;;  %v1129_v15 = vld [vmem:[%s1474_s1 + $0x98] sm:$0xff]   ;;  %v1133_v19 = vld [vmem:[%s1474_s1 + $0xa0] sm:$0xff]   ;;  %v1137_v23 = vld [vmem:[%s1474_s1 + $0xa8] sm:$0xff]  }
   0x9   :  { %1047 = vmatpush3.bf16.msra.mxu1 %v1121_v7  ;;  %978 = vmatprep.subr.bf16.mxu0 %v1122_v8  ;;  %v1138_v24 = vld [vmem:[%s1474_s1 + $0x70] sm:$0xff]   ;;  %v1142_v28 = vld [vmem:[%s1474_s1 + $0x78] sm:$0xff]   ;;  %v1427_v6 = vld [vmem:[%s1476_s2] ss:$0 sm:$0xff] }
   0xa   :  { %1048 = vmatprep.subr.bf16.mxu1 %v1123_v9  ;;  %v1139_v25 = vld [vmem:[%s1474_s1 + $0xf0] sm:$0xff]   ;;  %v1143_v29 = vld [vmem:[%s1474_s1 + $0xf8] sm:$0xff]  }
   0xb   :  { %v1140_v26 = vld [vmem:[%s1474_s1 + $0x30] sm:$0xff]   ;;  %v1144_v30 = vld [vmem:[%s1474_s1 + $0x38] sm:$0xff]  }
   0xc   :  { %979 = vmatpush3.bf16.msra.mxu0 %v1124_v10  ;;  %v1141_v27 = vld [vmem:[%s1474_s1 + $0xb0] sm:$0xff]   ;;  %v1145_v31 = vld [vmem:[%s1474_s1 + $0xb8] sm:$0xff]  }
   0xd   :  { %1049 = vmatpush3.bf16.msra.mxu1 %v1125_v11  ;;  %980 = vmatprep.subr.bf16.mxu0 %v1126_v12  ;;  %v1146_v32 = vld [vmem:[%s1475_s0] ss:$16 sps:$4 sm:$0xff]   ;;  %v1148_v33 = vld [vmem:[%s1475_s0 + $0x4] ss:$16 sps:$4 sm:$0xff]   ;;  %v1149_v34 = vld [vmem:[%s1475_s0 + $0x8] ss:$16 sps:$4 sm:$0xff]  }
   0xe   :  { %1050 = vmatprep.subr.bf16.mxu1 %v1127_v13  ;;  %v1151_v35 = vld [vmem:[%s1475_s0 + $0xc] ss:$16 sps:$4 sm:$0xff]   ;;  %526 = vmatprep.mubr.bf16.mxu0 %v1148_v33  ;;  %v1152_v36 = vld [vmem:[%s1475_s0 + $0x24] ss:$16 sps:$4 sm:$0xff]   ;;  %v1156_v38 = vld [vmem:[%s1475_s0 + $0x20] ss:$16 sps:$4 sm:$0xff]  }
   0xf   :  { %631 = vmatprep.mubr.bf16.mxu1 %v1151_v35  ;;  %v1154_v37 = vld [vmem:[%s1475_s0 + $0x2c] ss:$16 sps:$4 sm:$0xff]   ;;  %v1157_v39 = vld [vmem:[%s1475_s0 + $0x28] ss:$16 sps:$4 sm:$0xff]   ;;  %v1158_v40 = vld [vmem:[%s1475_s0 + $0x44] ss:$16 sps:$4 sm:$0xff]  }
  0x10   :  { %981 = vmatpush3.bf16.msra.mxu0 %v1128_v14  ;;  %v1160_v41 = vld [vmem:[%s1475_s0 + $0x4c] ss:$16 sps:$4 sm:$0xff]   ;;  %v1162_v42 = vld [vmem:[%s1475_s0 + $0x40] ss:$16 sps:$4 sm:$0xff]   ;;  %v1163_v43 = vld [vmem:[%s1475_s0 + $0x48] ss:$16 sps:$4 sm:$0xff]  }
  0x11   :  { %1051 = vmatpush3.bf16.msra.mxu1 %v1129_v15  ;;  %982 = vmatprep.subr.bf16.mxu0 %v1130_v16  ;;  %v1164_v44 = vld [vmem:[%s1475_s0 + $0x64] ss:$16 sps:$4 sm:$0xff]   ;;  %v1166_v45 = vld [vmem:[%s1475_s0 + $0x6c] ss:$16 sps:$4 sm:$0xff]   ;;  %v1168_v46 = vld [vmem:[%s1475_s0 + $0x60] ss:$16 sps:$4 sm:$0xff]  }
  0x12   :  { %1052 = vmatprep.subr.bf16.mxu1 %v1131_v17  ;;  %v1169_v47 = vld [vmem:[%s1475_s0 + $0x68] ss:$16 sps:$4 sm:$0xff]   ;;  %v1170_v48 = vld [vmem:[%s1475_s0 + $0x84] ss:$16 sps:$4 sm:$0xff]   ;;  %v1172_v49 = vld [vmem:[%s1475_s0 + $0x8c] ss:$16 sps:$4 sm:$0xff]  }
  0x13   :  { %v1174_v50 = vld [vmem:[%s1475_s0 + $0x80] ss:$16 sps:$4 sm:$0xff]   ;;  %v1175_v51 = vld [vmem:[%s1475_s0 + $0x88] ss:$16 sps:$4 sm:$0xff]   ;;  %v1176_v52 = vld [vmem:[%s1475_s0 + $0xa4] ss:$16 sps:$4 sm:$0xff]  }
  0x14   :  { %983 = vmatpush3.bf16.msra.mxu0 %v1132_v18  ;;  %v1178_v53 = vld [vmem:[%s1475_s0 + $0xac] ss:$16 sps:$4 sm:$0xff]   ;;  %v1180_v54 = vld [vmem:[%s1475_s0 + $0xa0] ss:$16 sps:$4 sm:$0xff]   ;;  %v1181_v55 = vld [vmem:[%s1475_s0 + $0xa8] ss:$16 sps:$4 sm:$0xff]  }
  0x15   :  { %1053 = vmatpush3.bf16.msra.mxu1 %v1133_v19  ;;  %984 = vmatprep.subr.bf16.mxu0 %v1134_v20  ;;  %v1182_v56 = vld [vmem:[%s1475_s0 + $0xc4] ss:$16 sps:$4 sm:$0xff]   ;;  %v1184_v57 = vld [vmem:[%s1475_s0 + $0xcc] ss:$16 sps:$4 sm:$0xff]   ;;  %v1186_v58 = vld [vmem:[%s1475_s0 + $0xc0] ss:$16 sps:$4 sm:$0xff]  }
  0x16   :  { %1054 = vmatprep.subr.bf16.mxu1 %v1135_v21  ;;  %v1187_v59 = vld [vmem:[%s1475_s0 + $0xc8] ss:$16 sps:$4 sm:$0xff]   ;;  %v1188_v60 = vld [vmem:[%s1475_s0 + $0xe4] ss:$16 sps:$4 sm:$0xff]   ;;  %v1190_v61 = vld [vmem:[%s1475_s0 + $0xec] ss:$16 sps:$4 sm:$0xff]  }
  0x17   :  { %v1192_v62 = vld [vmem:[%s1475_s0 + $0xe0] ss:$16 sps:$4 sm:$0xff]   ;;  %v1193_v63 = vld [vmem:[%s1475_s0 + $0xe8] ss:$16 sps:$4 sm:$0xff]   ;;  %v1194_v0 = vld [vmem:[%s1475_s0 + $0x104] ss:$16 sps:$4 sm:$0xff]  }
  0x18   :  { %985 = vmatpush3.bf16.msra.mxu0 %v1136_v22  ;;  %v1196_v1 = vld [vmem:[%s1475_s0 + $0x10c] ss:$16 sps:$4 sm:$0xff]   ;;  %v1198_v2 = vld [vmem:[%s1475_s0 + $0x100] ss:$16 sps:$4 sm:$0xff]   ;;  %v1199_v3 = vld [vmem:[%s1475_s0 + $0x108] ss:$16 sps:$4 sm:$0xff]  }
  0x19   :  { %1055 = vmatpush3.bf16.msra.mxu1 %v1137_v23  ;;  %986 = vmatprep.subr.bf16.mxu0 %v1138_v24 }
  0x1a   :  { %1056 = vmatprep.subr.bf16.mxu1 %v1139_v25 }
  0x1c   :  { %987 = vmatpush3.bf16.msra.mxu0 %v1140_v26 }
  0x1d   :  { %1057 = vmatpush3.bf16.msra.mxu1 %v1141_v27  ;;  %988 = vmatprep.subr.bf16.mxu0 %v1142_v28 }
  0x1e   :  { %1058 = vmatprep.subr.bf16.mxu1 %v1143_v29 }
  0x20   :  { %989 = vmatpush3.bf16.msra.mxu0 %v1144_v30 }
  0x21   :  { %1059 = vmatpush3.bf16.msra.mxu1 %v1145_v31 }
  0x23   :  { %527 = vmatmul.mubr.bf16.vlgmr.msra.gmra.mrb[0].mxu0 %v1146_v32 }
  0x24   :  { %632 = vmatmul.mubr.bf16.vlgmr.msra.gmra.mrb[0].mxu1 %v1149_v34  ;;  %534 = vmatprep.mubr.bf16.mxu0 %v1152_v36 }
  0x25   :  { %639 = vmatprep.mubr.bf16.mxu1 %v1154_v37 }
  0x2b   :  { %535 = vmatmul.mubr.bf16.gmra.mrb[4].mxu0 %v1156_v38 }
  0x2c   :  { %640 = vmatmul.mubr.bf16.gmra.mrb[4].mxu1 %v1157_v39  ;;  %542 = vmatprep.mubr.bf16.mxu0 %v1158_v40 }
  0x2d   :  { %647 = vmatprep.mubr.bf16.mxu1 %v1160_v41 }
  0x33   :  { %543 = vmatmul.mubr.bf16.gmra.mrb[8].mxu0 %v1162_v42 }
  0x34   :  { %648 = vmatmul.mubr.bf16.gmra.mrb[8].mxu1 %v1163_v43  ;;  %550 = vmatprep.mubr.bf16.mxu0 %v1164_v44 }
  0x35   :  { %655 = vmatprep.mubr.bf16.mxu1 %v1166_v45 }
  0x3b   :  { %551 = vmatmul.mubr.bf16.gmra.mrb[12].mxu0 %v1168_v46 }
  0x3c   :  { %656 = vmatmul.mubr.bf16.gmra.mrb[12].mxu1 %v1169_v47  ;;  %558 = vmatprep.mubr.bf16.mxu0 %v1170_v48 }
  0x3d   :  { %663 = vmatprep.mubr.bf16.mxu1 %v1172_v49 }
  0x43   :  { %559 = vmatmul.mubr.bf16.gmra.mrb[16].mxu0 %v1174_v50 }
  0x44   :  { %664 = vmatmul.mubr.bf16.gmra.mrb[16].mxu1 %v1175_v51  ;;  %566 = vmatprep.mubr.bf16.mxu0 %v1176_v52 }
  0x45   :  { %671 = vmatprep.mubr.bf16.mxu1 %v1178_v53 }
  0x4b   :  { %567 = vmatmul.mubr.bf16.gmra.mrb[20].mxu0 %v1180_v54 }
  0x4c   :  { %672 = vmatmul.mubr.bf16.gmra.mrb[20].mxu1 %v1181_v55  ;;  %574 = vmatprep.mubr.bf16.mxu0 %v1182_v56 }
  0x4d   :  { %679 = vmatprep.mubr.bf16.mxu1 %v1184_v57 }
  0x53   :  { %575 = vmatmul.mubr.bf16.gmra.mrb[24].mxu0 %v1186_v58 }
  0x54   :  { %680 = vmatmul.mubr.bf16.gmra.mrb[24].mxu1 %v1187_v59  ;;  %582 = vmatprep.mubr.bf16.mxu0 %v1188_v60 }
  0x55   :  { %687 = vmatprep.mubr.bf16.mxu1 %v1190_v61 }
  0x5b   :  { %583 = vmatmul.mubr.bf16.gmra.mrb[28].mxu0 %v1192_v62 }
  0x5c   :  { %688 = vmatmul.mubr.bf16.gmra.mrb[28].mxu1 %v1193_v63  ;;  %590 = vmatprep.mubr.bf16.mxu0 %v1194_v0 }
  0x5d   :  { %695 = vmatprep.mubr.bf16.mxu1 %v1196_v1 }
  0x63   :  { %591 = vmatmul.mubr.bf16.gmra.mrb[32].mxu0 %v1198_v2 }
  0x64   :  { %696 = vmatmul.mubr.bf16.gmra.mrb[32].mxu1 %v1199_v3 }
  0xf6   :  { %v990_v4 = vpop.f32.mrb[0].mxu0 }
  0xf7   :  { %v1060_v5 = vpop.f32.mrb[0].mxu1  ;;  %v991_v7 = vpop.f32.mrb[1].mxu0 }
  0xf8   :  { %v992_v8 = vadd.f32 %v991_v7, %v990_v4  ;;  %v1061_v9 = vpop.f32.mrb[1].mxu1  ;;  %v993_v10 = vpop.f32.mrb[2].mxu0 }
  0xf9   :  { %v1062_v11 = vadd.f32 %v1061_v9, %v1060_v5  ;;  %v1063_v12 = vpop.f32.mrb[2].mxu1  ;;  %v994_v13 = vpop.f32.mrb[3].mxu0 }
  0xfa   :  { %v529_v14 = vadd.f32 %v992_v8, %v1427_v6  ;;  %v995_v15 = vadd.f32 %v994_v13, %v993_v10  ;;  %v1064_v16 = vpop.f32.mrb[3].mxu1 }
  0xfb   :  { %v1065_v17 = vadd.f32 %v1064_v16, %v1063_v12 }
  0xfc   :  { %v634_v18 = vadd.f32 %v1062_v11, %v529_v14  ;;  %v532_v19 = vadd.f32 %v995_v15, %v1427_v6 }
  0xfe   :  { %v637_v20 = vadd.f32 %v1065_v17, %v532_v19  ;;  %v996_v21 = vpop.f32.mrb[4].mxu0  ;;  %v704_v24 = vmax.f32 %v634_v18, 0.0 }
  0xff   :  { %v1066_v22 = vpop.f32.mrb[4].mxu1  ;;  %v997_v23 = vpop.f32.mrb[5].mxu0 }
 0x100   :  { %v705_v25 = vmax.f32 %v637_v20, 0.0  ;;  %v998_v26 = vadd.f32 %v997_v23, %v996_v21  ;;  %v1067_v27 = vpop.f32.mrb[5].mxu1  ;;  %v999_v28 = vpop.f32.mrb[6].mxu0 }
 0x101   :  { %v1068_v29 = vadd.f32 %v1067_v27, %v1066_v22  ;;  %v1069_v30 = vpop.f32.mrb[6].mxu1  ;;  %v1000_v31 = vpop.f32.mrb[7].mxu0 }
 0x102   :  { %v924_v32 = vpack.c.bf16 %v705_v25, %v704_v24  ;;  %v537_v33 = vadd.f32 %v998_v26, %v1427_v6  ;;  %v1001_v34 = vadd.f32 %v1000_v31, %v999_v28  ;;  %v1070_v35 = vpop.f32.mrb[7].mxu1 }
 0x103   :  { %v1071_v36 = vadd.f32 %v1070_v35, %v1069_v30 }
 0x104   :  { %925 = vst [vmem:[%s1477_s3] sm:$0xff] %v924_v32   ;;  %v642_v37 = vadd.f32 %v1068_v29, %v537_v33  ;;  %v540_v38 = vadd.f32 %v1001_v34, %v1427_v6 }
 0x106   :  { %v645_v39 = vadd.f32 %v1071_v36, %v540_v38  ;;  %v1002_v40 = vpop.f32.mrb[8].mxu0  ;;  %v706_v43 = vmax.f32 %v642_v37, 0.0 }
 0x107   :  { %v1072_v41 = vpop.f32.mrb[8].mxu1  ;;  %v1003_v42 = vpop.f32.mrb[9].mxu0 }
 0x108   :  { %v707_v44 = vmax.f32 %v645_v39, 0.0  ;;  %v1004_v45 = vadd.f32 %v1003_v42, %v1002_v40  ;;  %v1073_v46 = vpop.f32.mrb[9].mxu1  ;;  %v1005_v47 = vpop.f32.mrb[10].mxu0 }
 0x109   :  { %v1074_v48 = vadd.f32 %v1073_v46, %v1072_v41  ;;  %v1075_v49 = vpop.f32.mrb[10].mxu1  ;;  %v1006_v50 = vpop.f32.mrb[11].mxu0 }
 0x10a   :  { %v929_v51 = vpack.c.bf16 %v707_v44, %v706_v43  ;;  %v545_v52 = vadd.f32 %v1004_v45, %v1427_v6  ;;  %v1007_v53 = vadd.f32 %v1006_v50, %v1005_v47  ;;  %v1076_v54 = vpop.f32.mrb[11].mxu1 }
 0x10b   :  { %v1077_v55 = vadd.f32 %v1076_v54, %v1075_v49 }
 0x10c   :  { %966 = vst [vmem:[%s1477_s3 + $0x8] sm:$0xff] %v929_v51   ;;  %v650_v56 = vadd.f32 %v1074_v48, %v545_v52  ;;  %v548_v57 = vadd.f32 %v1007_v53, %v1427_v6 }
 0x10e   :  { %v653_v58 = vadd.f32 %v1077_v55, %v548_v57  ;;  %v1008_v59 = vpop.f32.mrb[12].mxu0  ;;  %v708_v62 = vmax.f32 %v650_v56, 0.0 }
 0x10f   :  { %v1078_v60 = vpop.f32.mrb[12].mxu1  ;;  %v1009_v61 = vpop.f32.mrb[13].mxu0 }
 0x110   :  { %v709_v63 = vmax.f32 %v653_v58, 0.0  ;;  %v1010_v0 = vadd.f32 %v1009_v61, %v1008_v59  ;;  %v1079_v1 = vpop.f32.mrb[13].mxu1  ;;  %v1011_v2 = vpop.f32.mrb[14].mxu0 }
 0x111   :  { %v1080_v3 = vadd.f32 %v1079_v1, %v1078_v60  ;;  %v1081_v4 = vpop.f32.mrb[14].mxu1  ;;  %v1012_v5 = vpop.f32.mrb[15].mxu0 }
 0x112   :  { %v934_v7 = vpack.c.bf16 %v709_v63, %v708_v62  ;;  %v553_v8 = vadd.f32 %v1010_v0, %v1427_v6  ;;  %v1013_v9 = vadd.f32 %v1012_v5, %v1011_v2  ;;  %v1082_v10 = vpop.f32.mrb[15].mxu1 }
 0x113   :  { %v1083_v11 = vadd.f32 %v1082_v10, %v1081_v4 }
 0x114   :  { %967 = vst [vmem:[%s1477_s3 + $0x10] sm:$0xff] %v934_v7   ;;  %v658_v12 = vadd.f32 %v1080_v3, %v553_v8  ;;  %v556_v13 = vadd.f32 %v1013_v9, %v1427_v6 }
 0x116   :  { %v661_v14 = vadd.f32 %v1083_v11, %v556_v13  ;;  %v1014_v15 = vpop.f32.mrb[16].mxu0  ;;  %v710_v18 = vmax.f32 %v658_v12, 0.0 }
 0x117   :  { %v1084_v16 = vpop.f32.mrb[16].mxu1  ;;  %v1015_v17 = vpop.f32.mrb[17].mxu0 }
 0x118   :  { %v711_v19 = vmax.f32 %v661_v14, 0.0  ;;  %v1016_v20 = vadd.f32 %v1015_v17, %v1014_v15  ;;  %v1085_v21 = vpop.f32.mrb[17].mxu1  ;;  %v1017_v22 = vpop.f32.mrb[18].mxu0 }
 0x119   :  { %v1086_v23 = vadd.f32 %v1085_v21, %v1084_v16  ;;  %v1087_v24 = vpop.f32.mrb[18].mxu1  ;;  %v1018_v25 = vpop.f32.mrb[19].mxu0 }
 0x11a   :  { %v939_v26 = vpack.c.bf16 %v711_v19, %v710_v18  ;;  %v561_v27 = vadd.f32 %v1016_v20, %v1427_v6  ;;  %v1019_v28 = vadd.f32 %v1018_v25, %v1017_v22  ;;  %v1088_v29 = vpop.f32.mrb[19].mxu1 }
 0x11b   :  { %v1089_v30 = vadd.f32 %v1088_v29, %v1087_v24 }
 0x11c   :  { %968 = vst [vmem:[%s1477_s3 + $0x18] sm:$0xff] %v939_v26   ;;  %v666_v31 = vadd.f32 %v1086_v23, %v561_v27  ;;  %v564_v32 = vadd.f32 %v1019_v28, %v1427_v6 }
 0x11e   :  { %v669_v33 = vadd.f32 %v1089_v30, %v564_v32  ;;  %v1020_v34 = vpop.f32.mrb[20].mxu0  ;;  %v712_v37 = vmax.f32 %v666_v31, 0.0 }
 0x11f   :  { %v1090_v35 = vpop.f32.mrb[20].mxu1  ;;  %v1021_v36 = vpop.f32.mrb[21].mxu0 }
 0x120   :  { %v713_v38 = vmax.f32 %v669_v33, 0.0  ;;  %v1022_v39 = vadd.f32 %v1021_v36, %v1020_v34  ;;  %v1091_v40 = vpop.f32.mrb[21].mxu1  ;;  %v1023_v41 = vpop.f32.mrb[22].mxu0 }
 0x121   :  { %v1092_v42 = vadd.f32 %v1091_v40, %v1090_v35  ;;  %v1093_v43 = vpop.f32.mrb[22].mxu1  ;;  %v1024_v44 = vpop.f32.mrb[23].mxu0 }
 0x122   :  { %v944_v45 = vpack.c.bf16 %v713_v38, %v712_v37  ;;  %v569_v46 = vadd.f32 %v1022_v39, %v1427_v6  ;;  %v1025_v47 = vadd.f32 %v1024_v44, %v1023_v41  ;;  %v1094_v48 = vpop.f32.mrb[23].mxu1 }
 0x123   :  { %v1095_v49 = vadd.f32 %v1094_v48, %v1093_v43 }
 0x124   :  { %969 = vst [vmem:[%s1477_s3 + $0x20] sm:$0xff] %v944_v45   ;;  %v674_v50 = vadd.f32 %v1092_v42, %v569_v46  ;;  %v572_v51 = vadd.f32 %v1025_v47, %v1427_v6 }
 0x126   :  { %v677_v52 = vadd.f32 %v1095_v49, %v572_v51  ;;  %v1026_v53 = vpop.f32.mrb[24].mxu0  ;;  %v714_v56 = vmax.f32 %v674_v50, 0.0 }
 0x127   :  { %v1096_v54 = vpop.f32.mrb[24].mxu1  ;;  %v1027_v55 = vpop.f32.mrb[25].mxu0 }
 0x128   :  { %v715_v57 = vmax.f32 %v677_v52, 0.0  ;;  %v1028_v58 = vadd.f32 %v1027_v55, %v1026_v53  ;;  %v1097_v59 = vpop.f32.mrb[25].mxu1  ;;  %v1029_v60 = vpop.f32.mrb[26].mxu0 }
 0x129   :  { %v1098_v61 = vadd.f32 %v1097_v59, %v1096_v54  ;;  %v1099_v62 = vpop.f32.mrb[26].mxu1  ;;  %v1030_v63 = vpop.f32.mrb[27].mxu0 }
 0x12a   :  { %v949_v0 = vpack.c.bf16 %v715_v57, %v714_v56  ;;  %v577_v1 = vadd.f32 %v1028_v58, %v1427_v6  ;;  %v1031_v2 = vadd.f32 %v1030_v63, %v1029_v60  ;;  %v1100_v3 = vpop.f32.mrb[27].mxu1 }
 0x12b   :  { %v1101_v4 = vadd.f32 %v1100_v3, %v1099_v62 }
 0x12c   :  { %970 = vst [vmem:[%s1477_s3 + $0x28] sm:$0xff] %v949_v0   ;;  %v682_v5 = vadd.f32 %v1098_v61, %v577_v1  ;;  %v580_v7 = vadd.f32 %v1031_v2, %v1427_v6 }
 0x12e   :  { %v685_v8 = vadd.f32 %v1101_v4, %v580_v7  ;;  %v1032_v9 = vpop.f32.mrb[28].mxu0  ;;  %v716_v12 = vmax.f32 %v682_v5, 0.0 }
 0x12f   :  { %v1102_v10 = vpop.f32.mrb[28].mxu1  ;;  %v1033_v11 = vpop.f32.mrb[29].mxu0 }
 0x130   :  { %v717_v13 = vmax.f32 %v685_v8, 0.0  ;;  %v1034_v14 = vadd.f32 %v1033_v11, %v1032_v9  ;;  %v1103_v15 = vpop.f32.mrb[29].mxu1  ;;  %v1035_v16 = vpop.f32.mrb[30].mxu0 }
 0x131   :  { %v1104_v17 = vadd.f32 %v1103_v15, %v1102_v10  ;;  %v1105_v18 = vpop.f32.mrb[30].mxu1  ;;  %v1036_v19 = vpop.f32.mrb[31].mxu0 }
 0x132   :  { %v954_v20 = vpack.c.bf16 %v717_v13, %v716_v12  ;;  %v585_v21 = vadd.f32 %v1034_v14, %v1427_v6  ;;  %v1037_v22 = vadd.f32 %v1036_v19, %v1035_v16  ;;  %v1106_v23 = vpop.f32.mrb[31].mxu1 }
 0x133   :  { %v1107_v24 = vadd.f32 %v1106_v23, %v1105_v18 }
 0x134   :  { %971 = vst [vmem:[%s1477_s3 + $0x30] sm:$0xff] %v954_v20   ;;  %v690_v25 = vadd.f32 %v1104_v17, %v585_v21  ;;  %v588_v26 = vadd.f32 %v1037_v22, %v1427_v6 }
 0x136   :  { %v693_v27 = vadd.f32 %v1107_v24, %v588_v26  ;;  %v1038_v28 = vpop.f32.mrb[32].mxu0  ;;  %v718_v31 = vmax.f32 %v690_v25, 0.0 }
 0x137   :  { %v1108_v29 = vpop.f32.mrb[32].mxu1  ;;  %v1039_v30 = vpop.f32.mrb[33].mxu0 }
 0x138   :  { %v719_v32 = vmax.f32 %v693_v27, 0.0  ;;  %v1040_v33 = vadd.f32 %v1039_v30, %v1038_v28  ;;  %v1109_v34 = vpop.f32.mrb[33].mxu1  ;;  %v1041_v35 = vpop.f32.mrb[34].mxu0 }
 0x139   :  { %v1110_v36 = vadd.f32 %v1109_v34, %v1108_v29  ;;  %v1111_v37 = vpop.f32.mrb[34].mxu1  ;;  %v1042_v38 = vpop.f32.mrb[35].mxu0 }
 0x13a   :  { %v959_v39 = vpack.c.bf16 %v719_v32, %v718_v31  ;;  %v593_v40 = vadd.f32 %v1040_v33, %v1427_v6  ;;  %v1043_v41 = vadd.f32 %v1042_v38, %v1041_v35  ;;  %v1112_v42 = vpop.f32.mrb[35].mxu1 }
 0x13b   :  { %v1113_v43 = vadd.f32 %v1112_v42, %v1111_v37 }
 0x13c   :  { %972 = vst [vmem:[%s1477_s3 + $0x38] sm:$0xff] %v959_v39   ;;  %v698_v44 = vadd.f32 %v1110_v36, %v593_v40  ;;  %v596_v45 = vadd.f32 %v1043_v41, %v1427_v6 }
 0x13e   :  { %v701_v46 = vadd.f32 %v1113_v43, %v596_v45  ;;  %v720_v47 = vmax.f32 %v698_v44, 0.0 }
 0x140   :  { %v721_v48 = vmax.f32 %v701_v46, 0.0 }
 0x142   :  { %v964_v49 = vpack.c.bf16 %v721_v48, %v720_v47 }
 0x144   :  { %973 = vst [vmem:[%s1477_s3 + $0x40] sm:$0xff] %v964_v49  }

// kernel: ppo_forward.6
= control target key start
LH: loop header
LB: loop body
LE: loop exit
PB: predicated region body
PF: predicated region fallthrough
CT: control target
= control target key end

     0   :  { %v888_v33 = vmov 0.0   ;;  %vm889_vm0 = vmmov 0   ;;  %vm347_vm1 = vcmask 523264   ;;  %v890_v58 = vmov 0   ;;  %s1125_s1 = inlined_call_operand.vmem [shape: bf16[576,64], index: 1, kind: input, shape index: {}]   ;;  %s1126_s0 = inlined_call_operand.vmem [shape: bf16[16,576], index: 0, kind: input, shape index: {}]   ;;  %s1127_s3 = inlined_call_operand.vmem [shape: bf16[64,512], index: 3, kind: input, shape index: {}]   ;;  %s1128_s2 = inlined_call_operand.vmem [shape: f32[1,64], index: 2, kind: input, shape index: {}]   ;;  %s1129_s4 = inlined_call_operand.vmem [shape: f32[1,512], index: 4, kind: input, shape index: {}]   ;;  %s1130_s5 = inlined_call_operand.vmem [shape: f32[16,512], index: 5, kind: output, shape index: {}]  }
   0x1   :  { %v821_v0 = vld [vmem:[%s1125_s1 + $0x40] sm:$0xff]   ;;  %v825_v4 = vld [vmem:[%s1125_s1 + $0x48] sm:$0xff]   ;;  %v829_v8 = vld [vmem:[%s1125_s1 + $0x50] sm:$0xff]  }
   0x2   :  { %v822_v1 = vld [vmem:[%s1125_s1] sm:$0xff]   ;;  %757 = vmatprep.subr.bf16.mxu0 %v821_v0  ;;  %v826_v5 = vld [vmem:[%s1125_s1 + $0x8] sm:$0xff]   ;;  %v830_v9 = vld [vmem:[%s1125_s1 + $0x10] sm:$0xff]  }
   0x3   :  { %v823_v2 = vld [vmem:[%s1125_s1 + $0xc0] sm:$0xff]   ;;  %758 = vmatpush3.bf16.msra.mxu0 %v822_v1  ;;  %v827_v6 = vld [vmem:[%s1125_s1 + $0xc8] sm:$0xff]   ;;  %v831_v10 = vld [vmem:[%s1125_s1 + $0xd0] sm:$0xff]  }
   0x4   :  { %v824_v3 = vld [vmem:[%s1125_s1 + $0x80] sm:$0xff]   ;;  %779 = vmatprep.subr.bf16.mxu1 %v823_v2  ;;  %759 = vmatprep.subr.bf16.mxu0 %v825_v4  ;;  %v828_v7 = vld [vmem:[%s1125_s1 + $0x88] sm:$0xff]   ;;  %v832_v11 = vld [vmem:[%s1125_s1 + $0x90] sm:$0xff]  }
   0x5   :  { %780 = vmatpush3.bf16.msra.mxu1 %v824_v3  ;;  %v833_v12 = vld [vmem:[%s1125_s1 + $0x58] sm:$0xff]   ;;  %v837_v16 = vld [vmem:[%s1125_s1 + $0x60] sm:$0xff]   ;;  %v841_v20 = vld [vmem:[%s1125_s1 + $0x68] sm:$0xff]  }
   0x6   :  { %781 = vmatprep.subr.bf16.mxu1 %v827_v6  ;;  %v834_v13 = vld [vmem:[%s1125_s1 + $0x18] sm:$0xff]   ;;  %v838_v17 = vld [vmem:[%s1125_s1 + $0x20] sm:$0xff]   ;;  %v842_v21 = vld [vmem:[%s1125_s1 + $0x28] sm:$0xff]  }
   0x7   :  { %760 = vmatpush3.bf16.msra.mxu0 %v826_v5  ;;  %v835_v14 = vld [vmem:[%s1125_s1 + $0xd8] sm:$0xff]   ;;  %v839_v18 = vld [vmem:[%s1125_s1 + $0xe0] sm:$0xff]   ;;  %v843_v22 = vld [vmem:[%s1125_s1 + $0xe8] sm:$0xff]  }
   0x8   :  { %761 = vmatprep.subr.bf16.mxu0 %v829_v8  ;;  %v836_v15 = vld [vmem:[%s1125_s1 + $0x98] sm:$0xff]   ;;  %v840_v19 = vld [vmem:[%s1125_s1 + $0xa0] sm:$0xff]   ;;  %v844_v23 = vld [vmem:[%s1125_s1 + $0xa8] sm:$0xff]  }
   0x9   :  { %782 = vmatpush3.bf16.msra.mxu1 %v828_v7  ;;  %v845_v24 = vld [vmem:[%s1125_s1 + $0x70] sm:$0xff]   ;;  %v849_v28 = vld [vmem:[%s1125_s1 + $0x78] sm:$0xff]   ;;  %v858_v36 = vld [vmem:[%s1126_s0 + $0xc] ss:$20 sps:$4 sm:$0xff]  }
   0xa   :  { %783 = vmatprep.subr.bf16.mxu1 %v831_v10  ;;  %v846_v25 = vld [vmem:[%s1125_s1 + $0x30] sm:$0xff]   ;;  %v850_v29 = vld [vmem:[%s1125_s1 + $0x38] sm:$0xff]   ;;  %v859_v37 = vld [vmem:[%s1125_s1 + $0x100] sm:$0xff]   ;;  %424 = vmatprep.mubr.bf16.mxu1 %v858_v36 }
   0xb   :  { %762 = vmatpush3.bf16.msra.mxu0 %v830_v9  ;;  %v847_v26 = vld [vmem:[%s1125_s1 + $0xf0] sm:$0xff]   ;;  %v851_v30 = vld [vmem:[%s1125_s1 + $0xf8] sm:$0xff]   ;;  %v860_v38 = vld [vmem:[%s1125_s1 + $0x108] sm:$0xff]  }
   0xc   :  { %763 = vmatprep.subr.bf16.mxu0 %v833_v12  ;;  %v848_v27 = vld [vmem:[%s1125_s1 + $0xb0] sm:$0xff]   ;;  %v854_v32 = vld [vmem:[%s1126_s0 + $0x4] ss:$20 sps:$4 sm:$0xff]   ;;  %v856_v35 = vld [vmem:[%s1126_s0 + $0x8] ss:$20 sps:$4 sm:$0xff]  }
   0xd   :  { %784 = vmatpush3.bf16.msra.mxu1 %v832_v11  ;;  %v852_v31 = vld [vmem:[%s1126_s0] ss:$20 sps:$4 sm:$0xff]   ;;  %v855_v34 = vld [vmem:[%s1125_s1 + $0xb8] sm:$0xff]   ;;  %383 = vmatprep.mubr.bf16.mxu0 %v854_v32  ;;  %v863_v41 = vld [vmem:[%s1126_s0 + $0x10] ss:$20 sps:$4 sm:$0xff]  }
   0xe   :  { %785 = vmatprep.subr.bf16.mxu1 %v835_v14  ;;  %v861_v39 = vld [vmem:[%s1125_s1 + $0x110] sm:$0xff]   ;;  %v862_v40 = vld [vmem:[%s1125_s1 + $0x118] sm:$0xff]   ;;  %v696_v60 = vld [vmem:[%s1128_s2] ss:$0 sm:$0xff] }
   0xf   :  { %764 = vmatpush3.bf16.msra.mxu0 %v834_v13  ;;  %v864_v42 = vld [vmem:[%s1127_s3] ss:$16 sps:$4 sm:$0xff]   ;;  %v866_v43 = vld [vmem:[%s1127_s3 + $0x4] ss:$16 sps:$4 sm:$0xff]   ;;  %v867_v44 = vld [vmem:[%s1127_s3 + $0x8] ss:$16 sps:$4 sm:$0xff]  }
  0x10   :  { %765 = vmatprep.subr.bf16.mxu0 %v837_v16  ;;  %v869_v45 = vld [vmem:[%s1127_s3 + $0xc] ss:$16 sps:$4 sm:$0xff]   ;;  %v870_v46 = vld [vmem:[%s1127_s3 + $0x20] ss:$16 sps:$4 sm:$0xff]   ;;  %v872_v47 = vld [vmem:[%s1127_s3 + $0x24] ss:$16 sps:$4 sm:$0xff]  }
  0x11   :  { %786 = vmatpush3.bf16.msra.mxu1 %v836_v15  ;;  %v873_v48 = vld [vmem:[%s1127_s3 + $0x28] ss:$16 sps:$4 sm:$0xff]   ;;  %v875_v49 = vld [vmem:[%s1127_s3 + $0x2c] ss:$16 sps:$4 sm:$0xff]   ;;  %v878_v50 = vld [vmem:[%s1127_s3 + $0x44] ss:$16 sps:$4 sm:$0xff]  }
  0x12   :  { %787 = vmatprep.subr.bf16.mxu1 %v839_v18  ;;  %v881_v51 = vld [vmem:[%s1127_s3 + $0x4c] ss:$16 sps:$4 sm:$0xff]   ;;  %v876_v52 = vld [vmem:[%s1127_s3 + $0x40] ss:$16 sps:$4 sm:$0xff]   ;;  %v879_v53 = vld [vmem:[%s1127_s3 + $0x48] ss:$16 sps:$4 sm:$0xff]  }
  0x13   :  { %766 = vmatpush3.bf16.msra.mxu0 %v838_v17  ;;  %v884_v54 = vld [vmem:[%s1127_s3 + $0x64] ss:$16 sps:$4 sm:$0xff]   ;;  %v887_v55 = vld [vmem:[%s1127_s3 + $0x6c] ss:$16 sps:$4 sm:$0xff]   ;;  %v882_v56 = vld [vmem:[%s1127_s3 + $0x60] ss:$16 sps:$4 sm:$0xff]  }
  0x14   :  { %767 = vmatprep.subr.bf16.mxu0 %v841_v20  ;;  %v885_v57 = vld [vmem:[%s1127_s3 + $0x68] ss:$16 sps:$4 sm:$0xff]  }
  0x15   :  { %788 = vmatpush3.bf16.msra.mxu1 %v840_v19 }
  0x16   :  { %789 = vmatprep.subr.bf16.mxu1 %v843_v22 }
  0x17   :  { %768 = vmatpush3.bf16.msra.mxu0 %v842_v21  ;;  %v495_v21 = vlaneseq }
  0x18   :  { %769 = vmatprep.subr.bf16.mxu0 %v845_v24 }
  0x19   :  { %790 = vmatpush3.bf16.msra.mxu1 %v844_v23  ;;  %v496_v22 = vshrl.u32 %v495_v21, 7 }
  0x1a   :  { %791 = vmatprep.subr.bf16.mxu1 %v847_v26 }
  0x1b   :  { %770 = vmatpush3.bf16.msra.mxu0 %v846_v25  ;;  %v497_v23 = vsub.s32 0, %v496_v22  ;;  %v505_v24 = vsub.s32 2, %v496_v22  ;;  %v493_v25 = vld [vmem:[%s1129_s4] sm:$0xf]  ;;  %v501_v26 = vsub.s32 1, %v496_v22 }
  0x1c   :  { %771 = vmatprep.subr.bf16.mxu0 %v849_v28 }
  0x1d   :  { %792 = vmatpush3.bf16.msra.mxu1 %v848_v27  ;;  %v509_v27 = vsub.s32 3, %v496_v22  ;;  %v498_v28 = vrot.slane %v493_v25, %v497_v23 }
  0x1e   :  { %793 = vmatprep.subr.bf16.mxu1 %v851_v30  ;;  %v502_v30 = vrot.slane %v493_v25, %v501_v26 }
  0x1f   :  { %772 = vmatpush3.bf16.msra.mxu0 %v850_v29  ;;  %v506_v29 = vrot.slane %v493_v25, %v505_v24 }
  0x20   :  { %806 = vmatprep.subr.bf16.mxu0 %v888_v33 }
  0x21   :  { %794 = vmatpush3.bf16.msra.mxu1 %v855_v34 }
  0x22   :  { %384 = vmatmul.mubr.bf16.vlgmr.msra.gmra.mrb[0].mxu0 %v852_v31  ;;  %598 = vmatprep.subr.bf16.mxu1 %v866_v43  ;;  %v510_v31 = vrot.slane %v493_v25, %v509_v27 }
  0x23   :  { %814 = vmatprep.mubr.msk.bf16.mxu0 %vm889_vm0, %v888_v33  ;;  %807 = vmatpush3.bf16.msra.mxu0 %v859_v37 }
  0x24   :  { %425 = vmatmul.mubr.bf16.vlgmr.msra.gmra.mrb[0].mxu1 %v856_v35  ;;  %808 = vmatprep.subr.bf16.mxu0 %v888_v33 }
  0x25   :  { %599 = vmatpush1.bf16.msra.mxu1 %v864_v42  ;;  %630 = vmatprep.mubr.bf16.mxu1 %v890_v58 }
  0x26   :  { %600 = vmatprep.subr.bf16.mxu1 %v872_v47 }
  0x27   :  { %809 = vmatpush3.bf16.msra.mxu0 %v860_v38 }
  0x28   :  { %810 = vmatprep.subr.bf16.mxu0 %v888_v33 }
  0x29   :  { %601 = vmatpush1.bf16.msra.mxu1 %v870_v46 }
  0x2a   :  { %602 = vmatprep.subr.bf16.mxu1 %v878_v50 }
  0x2b   :  { %811 = vmatpush3.bf16.msra.mxu0 %v861_v39 }
  0x2c   :  { %812 = vmatprep.subr.bf16.mxu0 %v888_v33 }
  0x2d   :  { %603 = vmatpush1.bf16.msra.mxu1 %v876_v52 }
  0x2e   :  { %604 = vmatprep.subr.bf16.mxu1 %v884_v54 }
  0x2f   :  { %813 = vmatpush3.bf16.msra.mxu0 %v862_v40 }
  0x30   :  { %641 = vmatprep.subr.bf16.mxu0 %v869_v45 }
  0x31   :  { %605 = vmatpush1.bf16.msra.mxu1 %v882_v56 }
  0x32   :  { %815 = vmatmul.mubr.msk.bf16.vlgmr.msra.gmra.mrb[4].mxu0 %vm347_vm1, %v863_v41 }
  0x33   :  { %642 = vmatpush1.bf16.msra.mxu0 %v867_v44  ;;  %673 = vmatprep.mubr.bf16.mxu0 %v890_v58 }
  0x34   :  { %643 = vmatprep.subr.bf16.mxu0 %v875_v49 }
  0x37   :  { %644 = vmatpush1.bf16.msra.mxu0 %v873_v48 }
  0x38   :  { %645 = vmatprep.subr.bf16.mxu0 %v881_v51 }
  0x3b   :  { %646 = vmatpush1.bf16.msra.mxu0 %v879_v53 }
  0x3c   :  { %647 = vmatprep.subr.bf16.mxu0 %v887_v55 }
  0x3f   :  { %648 = vmatpush1.bf16.msra.mxu0 %v885_v57 }
  0xf5   :  { %v773_v59 = vpop.f32.mrb[0].mxu0 }
  0xf6   :  { %v774_v61 = vpop.f32.mrb[1].mxu0 }
  0xf7   :  { %v775_v62 = vadd.f32 %v774_v61, %v773_v59  ;;  %v776_v63 = vpop.f32.mrb[2].mxu0  ;;  %v795_v0 = vpop.f32.mrb[0].mxu1 }
  0xf8   :  { %v777_v1 = vpop.f32.mrb[3].mxu0  ;;  %v796_v4 = vpop.f32.mrb[1].mxu1 }
  0xf9   :  { %v386_v2 = vadd.f32 %v775_v62, %v696_v60  ;;  %v778_v3 = vadd.f32 %v777_v1, %v776_v63  ;;  %v797_v5 = vadd.f32 %v796_v4, %v795_v0  ;;  %v798_v6 = vpop.f32.mrb[2].mxu1 }
  0xfa   :  { %v799_v8 = vpop.f32.mrb[3].mxu1 }
  0xfb   :  { %v389_v7 = vadd.f32 %v778_v3, %v696_v60  ;;  %v800_v9 = vadd.f32 %v799_v8, %v798_v6  ;;  %v427_v10 = vadd.f32 %v797_v5, %v386_v2 }
  0xfd   :  { %v430_v11 = vadd.f32 %v800_v9, %v389_v7 }
 0x105   :  { %v467_v12 = vpop.f32.mrb[4].mxu0 }
 0x106   :  { %v468_v13 = vadd.f32 %v467_v12, %v427_v10  ;;  %v816_v14 = vpop.f32.mrb[5].mxu0 }
 0x107   :  { %v470_v15 = vpop.f32.mrb[6].mxu0 }
 0x108   :  { %v471_v16 = vadd.f32 %v470_v15, %v430_v11  ;;  %v817_v17 = vpop.f32.mrb[7].mxu0  ;;  %v474_v18 = vmax.f32 %v468_v13, 0.0 }
 0x10a   :  { %v475_v19 = vmax.f32 %v471_v16, 0.0 }
 0x10c   :  { %v476_v20 = vpack.c.bf16 %v475_v19, %v474_v18 }
 0x10e   :  { %755 = vmatmul.mubr.msk.bf16.vlgmr.msra.gmra.mrb[4].mxu1 %vm347_vm1, %v476_v20  ;;  %756 = vmatmul.mubr.msk.bf16.vlgmr.msra.gmra.mrb[8].mxu0 %vm347_vm1, %v476_v20 }
 0x1e1   :  { %v632_v32 = vpop.f32.mrb[4].mxu1  ;;  %v675_v33 = vpop.f32.mrb[8].mxu0 }
 0x1e2   :  { %v633_v34 = vadd.f32 %v632_v32, %v498_v28  ;;  %v676_v35 = vadd.f32 %v675_v33, %v506_v29  ;;  %v634_v36 = vpop.f32.mrb[5].mxu1  ;;  %v677_v37 = vpop.f32.mrb[9].mxu0 }
 0x1e3   :  { %v635_v38 = vadd.f32 %v634_v36, %v502_v30  ;;  %v678_v39 = vadd.f32 %v677_v37, %v510_v31  ;;  %v636_v40 = vpop.f32.mrb[6].mxu1  ;;  %v679_v41 = vpop.f32.mrb[10].mxu0 }
 0x1e4   :  { %684 = vst [vmem:[%s1130_s5] sm:$0xff] %v633_v34  ;;  %686 = vst [vmem:[%s1130_s5 + $0x10] sm:$0xff] %v676_v35  ;;  %v637_v42 = vadd.f32 %v636_v40, %v498_v28  ;;  %v680_v43 = vadd.f32 %v679_v41, %v506_v29  ;;  %v638_v44 = vpop.f32.mrb[7].mxu1  ;;  %v681_v45 = vpop.f32.mrb[11].mxu0 }
 0x1e5   :  { %685 = vst [vmem:[%s1130_s5 + $0x8] sm:$0xff] %v635_v38  ;;  %687 = vst [vmem:[%s1130_s5 + $0x18] sm:$0xff] %v678_v39  ;;  %v639_v46 = vadd.f32 %v638_v44, %v502_v30  ;;  %v682_v47 = vadd.f32 %v681_v45, %v510_v31 }
 0x1e6   :  { %688 = vst [vmem:[%s1130_s5 + $0x20] sm:$0xff] %v637_v42  ;;  %690 = vst [vmem:[%s1130_s5 + $0x30] sm:$0xff] %v680_v43 }
 0x1e7   :  { %689 = vst [vmem:[%s1130_s5 + $0x28] sm:$0xff] %v639_v46  ;;  %691 = vst [vmem:[%s1130_s5 + $0x38] sm:$0xff] %v682_v47 }

// kernel: ppo_forward.7
= control target key start
LH: loop header
LB: loop body
LE: loop exit
PB: predicated region body
PF: predicated region fallthrough
CT: control target
= control target key end

     0   :  { %s934_s27 = smov 0   ;;  %s1214_s0 = inlined_call_operand.vmem [shape: f32[8,8,512], index: 0, kind: input, shape index: {}]   ;;  %s1215_s1 = inlined_call_operand.vmem [shape: f32[128,512], index: 1, kind: input, shape index: {}]   ;;  %s1216_s2 = inlined_call_operand.vmem [shape: f32[8,128], index: 2, kind: input, shape index: {}, may-alias: {2,3}]   ;;  %s1217_s3 = inlined_call_operand.vmem [shape: f32[8,128], index: 3, kind: input, shape index: {}, may-alias: {2,3}]   ;;  %s1218_s4 = inlined_call_operand.vmem [shape: bf16[128,128], index: 4, kind: input, shape index: {}]   ;;  %s1219_s5 = inlined_call_operand.vmem [shape: f32[1,128], index: 5, kind: input, shape index: {}]   ;;  %s1220_s6 = inlined_call_operand.vmem [shape: f32[8,8,128], index: 6, kind: output, shape index: {0}]   ;;  %s1221_s7 = inlined_call_operand.vmem [shape: f32[8,128], index: 7, kind: output, shape index: {1}]   ;;  %s1222_s8 = inlined_call_operand.vmem [shape: f32[8,128], index: 8, kind: output, shape index: {2}]  }
   0x1 LB: > { %s728_s28 = sadd.s32 4294967295, %s885_s27   ;;  %p732_p0 = scmp.ge.s32.totalorder %s885_s27, 1  ;;  %s885_s27 = sphi %s934_s27, %s19_s27  }
   0x2   : > { %p257_p1 = scmp.lt.s32.totalorder %s885_s27, 9 }
   0x4   : > { %p258_p2 = pnand %p732_p0, %p257_p1 }
   0x5   : > { %p290_p3 = scmp.lt.s32.totalorder (!%p258_p2), %s728_s28, 7  ;;  %p736_p4 = scmp.ne.s32.totalorder (!%p258_p2), %s728_s28, 0 }
   0x6   : > { %261 = sbr.rel (%p258_p2) target bundleno = 549 (0x225), region = 44 }
   0xd   : > { %s291_s29 = scalar_select %p290_p3, %s728_s28, 7 }
   0xe   : > { %303 = sbr.rel (%p736_p4) target bundleno = 21 (0x15), region = 48  ;;  %v304_v0 = vld [vmem:[%s1216_s2] sm:$0xff] (!%p736_p4) }
   0xf   : > { %s751_s30 = sshll.u32 %s291_s29, 5  ;;  %s735_s9 = sshll.u32 %s291_s29, 3  ;;  %v306_v1 = vld [vmem:[%s1217_s3] sm:$0xff] (!%p736_p4)  ;;  %305 = vst [vmem:[%s1221_s7] sm:$0xff] (!%p736_p4), %v304_v0 }
  0x10   : > { %s945_s12 = scalar_lea.vmem %s1214_s0, %s751_s30  ;;  %s950_s15 = scalar_lea.vmem %s1220_s6, %s735_s9  ;;  %307 = vst [vmem:[%s1222_s8] sm:$0xff] (!%p736_p4), %v306_v1 }
  0x15 PF: > { %v315_v2 = vld [vmem:[%s1215_s1 + $0x8] sm:$0xff]  ;;  %v314_v4 = vld [vmem:[%s1215_s1] sm:$0xff]  ;;  %v887_v9 = vmov 0.0   ;;  %v317_v49 = vld [vmem:[%s1215_s1 + $0x18] sm:$0xff]  ;;  %vm888_vm0 = vmmov 0  }
  0x16   : > { %v319_v3 = vld [vmem:[%s1215_s1 + $0x28] sm:$0xff]  ;;  %v318_v6 = vld [vmem:[%s1215_s1 + $0x20] sm:$0xff]  ;;  %442 = vmatprep.mubr.f32.mxu1 %v887_v9  ;;  %761 = vmatprep.subr.bf16.mxu0 %v887_v9  ;;  %v321_v50 = vld [vmem:[%s1215_s1 + $0x38] sm:$0xff] }
  0x17   : > { %v781_v5 = vpack.c.bf16 %v319_v3, %v315_v2  ;;  %v323_v7 = vld [vmem:[%s1215_s1 + $0x48] sm:$0xff]  ;;  %v783_v10 = vpack.c.bf16 %v318_v6, %v314_v4  ;;  %v322_v12 = vld [vmem:[%s1215_s1 + $0x40] sm:$0xff]  ;;  %v813_v53 = vpack.c.bf16 %v321_v50, %v317_v49  ;;  %v316_v54 = vld [vmem:[%s1215_s1 + $0x10] sm:$0xff]  ;;  %777 = vmatprep.mubr.msk.bf16.mxu0 %vm888_vm0, %v887_v9 }
  0x18   : > { %v327_v8 = vld [vmem:[%s1215_s1 + $0x68] sm:$0xff]  ;;  %v326_v13 = vld [vmem:[%s1215_s1 + $0x60] sm:$0xff]  ;;  %v320_v55 = vld [vmem:[%s1215_s1 + $0x30] sm:$0xff] }
  0x19   : > { %v785_v11 = vpack.c.bf16 %v327_v8, %v323_v7  ;;  %v331_v14 = vld [vmem:[%s1215_s1 + $0x88] sm:$0xff]  ;;  %782 = vmatprep.subr.bf16.mxu1 %v781_v5  ;;  %v787_v16 = vpack.c.bf16 %v326_v13, %v322_v12  ;;  %v330_v18 = vld [vmem:[%s1215_s1 + $0x80] sm:$0xff]  ;;  %v325_v56 = vld [vmem:[%s1215_s1 + $0x58] sm:$0xff]  ;;  %v815_v59 = vpack.c.bf16 %v320_v55, %v316_v54 }
  0x1a   : > { %v335_v15 = vld [vmem:[%s1215_s1 + $0xa8] sm:$0xff]  ;;  %784 = vmatpush1.bf16.msra.mxu1 %v783_v10  ;;  %v334_v19 = vld [vmem:[%s1215_s1 + $0xa0] sm:$0xff]  ;;  %v329_v57 = vld [vmem:[%s1215_s1 + $0x78] sm:$0xff] }
  0x1b   : > { %786 = vmatprep.subr.bf16.mxu1 %v785_v11  ;;  %v789_v17 = vpack.c.bf16 %v335_v15, %v331_v14  ;;  %v339_v20 = vld [vmem:[%s1215_s1 + $0xc8] sm:$0xff]  ;;  %v791_v22 = vpack.c.bf16 %v334_v19, %v330_v18  ;;  %v338_v24 = vld [vmem:[%s1215_s1 + $0xc0] sm:$0xff]  ;;  %v817_v60 = vpack.c.bf16 %v329_v57, %v325_v56  ;;  %v324_v61 = vld [vmem:[%s1215_s1 + $0x50] sm:$0xff] }
  0x1c   : > { %v343_v21 = vld [vmem:[%s1215_s1 + $0xe8] sm:$0xff]  ;;  %v342_v25 = vld [vmem:[%s1215_s1 + $0xe0] sm:$0xff]  ;;  %v328_v62 = vld [vmem:[%s1215_s1 + $0x70] sm:$0xff] }
  0x1d   : > { %v793_v23 = vpack.c.bf16 %v343_v21, %v339_v20  ;;  %v347_v26 = vld [vmem:[%s1215_s1 + $0x108] sm:$0xff]  ;;  %v795_v28 = vpack.c.bf16 %v342_v25, %v338_v24  ;;  %v346_v30 = vld [vmem:[%s1215_s1 + $0x100] sm:$0xff]  ;;  %v333_v63 = vld [vmem:[%s1215_s1 + $0x98] sm:$0xff]  ;;  %v819_v1 = vpack.c.bf16 %v328_v62, %v324_v61 }
  0x1e   : > { %788 = vmatpush1.bf16.msra.mxu1 %v787_v16  ;;  %v351_v27 = vld [vmem:[%s1215_s1 + $0x128] sm:$0xff]  ;;  %v350_v31 = vld [vmem:[%s1215_s1 + $0x120] sm:$0xff]  ;;  %v337_v0 = vld [vmem:[%s1215_s1 + $0xb8] sm:$0xff] }
  0x1f   : > { %790 = vmatprep.subr.bf16.mxu1 %v789_v17  ;;  %v797_v29 = vpack.c.bf16 %v351_v27, %v347_v26  ;;  %v355_v32 = vld [vmem:[%s1215_s1 + $0x148] sm:$0xff]  ;;  %v799_v34 = vpack.c.bf16 %v350_v31, %v346_v30  ;;  %v354_v36 = vld [vmem:[%s1215_s1 + $0x140] sm:$0xff]  ;;  %v821_v2 = vpack.c.bf16 %v337_v0, %v333_v63  ;;  %v332_v3 = vld [vmem:[%s1215_s1 + $0x90] sm:$0xff] }
  0x20   : > { %v359_v33 = vld [vmem:[%s1215_s1 + $0x168] sm:$0xff]  ;;  %v358_v37 = vld [vmem:[%s1215_s1 + $0x160] sm:$0xff]  ;;  %v336_v4 = vld [vmem:[%s1215_s1 + $0xb0] sm:$0xff] }
  0x21   : > { %v801_v35 = vpack.c.bf16 %v359_v33, %v355_v32  ;;  %v363_v38 = vld [vmem:[%s1215_s1 + $0x188] sm:$0xff]  ;;  %v803_v40 = vpack.c.bf16 %v358_v37, %v354_v36  ;;  %v362_v41 = vld [vmem:[%s1215_s1 + $0x180] sm:$0xff]  ;;  %v341_v5 = vld [vmem:[%s1215_s1 + $0xd8] sm:$0xff]  ;;  %v823_v7 = vpack.c.bf16 %v336_v4, %v332_v3 }
  0x22   : > { %792 = vmatpush1.bf16.msra.mxu1 %v791_v22  ;;  %v367_v39 = vld [vmem:[%s1215_s1 + $0x1a8] sm:$0xff]  ;;  %v366_v43 = vld [vmem:[%s1215_s1 + $0x1a0] sm:$0xff]  ;;  %v345_v6 = vld [vmem:[%s1215_s1 + $0xf8] sm:$0xff] }
  0x23   : > { %794 = vmatprep.subr.bf16.mxu1 %v793_v23  ;;  %v805_v42 = vpack.c.bf16 %v367_v39, %v363_v38  ;;  %v371_v44 = vld [vmem:[%s1215_s1 + $0x1c8] sm:$0xff]  ;;  %v370_v46 = vld [vmem:[%s1215_s1 + $0x1c0] sm:$0xff]  ;;  %v807_v48 = vpack.c.bf16 %v366_v43, %v362_v41  ;;  %v825_v8 = vpack.c.bf16 %v345_v6, %v341_v5  ;;  %v340_v10 = vld [vmem:[%s1215_s1 + $0xd0] sm:$0xff] }
  0x24   : > { %v375_v45 = vld [vmem:[%s1215_s1 + $0x1e8] sm:$0xff]  ;;  %v374_v47 = vld [vmem:[%s1215_s1 + $0x1e0] sm:$0xff]  ;;  %v344_v11 = vld [vmem:[%s1215_s1 + $0xf0] sm:$0xff] }
  0x25   : > { %v809_v51 = vpack.c.bf16 %v375_v45, %v371_v44  ;;  %v811_v52 = vpack.c.bf16 %v374_v47, %v370_v46  ;;  %v308_v58 = vld [vmem:[%s1221_s7] sm:$0xff]  ;;  %v349_v12 = vld [vmem:[%s1215_s1 + $0x118] sm:$0xff]  ;;  %v827_v14 = vpack.c.bf16 %v344_v11, %v340_v10  ;;  %v348_v16 = vld [vmem:[%s1215_s1 + $0x110] sm:$0xff] }
  0x26   : > { %796 = vmatpush1.bf16.msra.mxu1 %v795_v28  ;;  %v353_v13 = vld [vmem:[%s1215_s1 + $0x138] sm:$0xff]  ;;  %v352_v17 = vld [vmem:[%s1215_s1 + $0x130] sm:$0xff]  ;;  %v855_v37 = vld [vmem:[%s1218_s4] sm:$0xff]  }
  0x27   : > { %798 = vmatprep.subr.bf16.mxu1 %v797_v29  ;;  %v829_v15 = vpack.c.bf16 %v353_v13, %v349_v12  ;;  %v357_v18 = vld [vmem:[%s1215_s1 + $0x158] sm:$0xff]  ;;  %v831_v20 = vpack.c.bf16 %v352_v17, %v348_v16  ;;  %v356_v22 = vld [vmem:[%s1215_s1 + $0x150] sm:$0xff]  ;;  %762 = vmatpush3.bf16.msra.mxu0 %v855_v37  ;;  %v856_v38 = vld [vmem:[%s1218_s4 + $0x8] sm:$0xff]  }
  0x28   : > { %v361_v19 = vld [vmem:[%s1215_s1 + $0x178] sm:$0xff]  ;;  %v360_v23 = vld [vmem:[%s1215_s1 + $0x170] sm:$0xff]  ;;  %763 = vmatprep.subr.bf16.mxu0 %v887_v9  ;;  %v859_v41 = vld [vmem:[%s1218_s4 + $0x20] sm:$0xff]  }
  0x29   : > { %v833_v21 = vpack.c.bf16 %v361_v19, %v357_v18  ;;  %v365_v24 = vld [vmem:[%s1215_s1 + $0x198] sm:$0xff]  ;;  %v835_v26 = vpack.c.bf16 %v360_v23, %v356_v22  ;;  %v364_v28 = vld [vmem:[%s1215_s1 + $0x190] sm:$0xff]  ;;  %v311_v47 = vld [vmem:[%s945_s12 + $0x8] sm:$0xff] }
  0x2a   : > { %800 = vmatpush1.bf16.msra.mxu1 %v799_v34  ;;  %v369_v25 = vld [vmem:[%s1215_s1 + $0x1b8] sm:$0xff]  ;;  %v368_v29 = vld [vmem:[%s1215_s1 + $0x1b0] sm:$0xff]  ;;  %v309_v0 = vld [vmem:[%s1222_s8] sm:$0xff] }
  0x2b   : > { %802 = vmatprep.subr.bf16.mxu1 %v801_v35  ;;  %v837_v27 = vpack.c.bf16 %v369_v25, %v365_v24  ;;  %v373_v30 = vld [vmem:[%s1215_s1 + $0x1d8] sm:$0xff]  ;;  %v839_v32 = vpack.c.bf16 %v368_v29, %v364_v28  ;;  %v372_v34 = vld [vmem:[%s1215_s1 + $0x1d0] sm:$0xff]  ;;  %764 = vmatpush3.bf16.msra.mxu0 %v856_v38  ;;  %v740_v13 = vld [vmem:[%s1219_s5] ss:$0 sm:$0xff] }
  0x2c   : > { %v377_v31 = vld [vmem:[%s1215_s1 + $0x1f8] sm:$0xff]  ;;  %v376_v35 = vld [vmem:[%s1215_s1 + $0x1f0] sm:$0xff]  ;;  %765 = vmatprep.subr.bf16.mxu0 %v887_v9 }
  0x2d   : > { %v841_v33 = vpack.c.bf16 %v377_v31, %v373_v30  ;;  %v843_v36 = vpack.c.bf16 %v376_v35, %v372_v34  ;;  %v857_v39 = vld [vmem:[%s1218_s4 + $0x10] sm:$0xff]   ;;  %v862_v44 = vld [vmem:[%s1218_s4 + $0x38] sm:$0xff]  }
  0x2e   : > { %804 = vmatpush1.bf16.msra.mxu1 %v803_v40  ;;  %v858_v40 = vld [vmem:[%s1218_s4 + $0x18] sm:$0xff]   ;;  %v861_v43 = vld [vmem:[%s1218_s4 + $0x30] sm:$0xff]  }
  0x2f   : > { %806 = vmatprep.subr.bf16.mxu1 %v805_v42  ;;  %766 = vmatpush3.bf16.msra.mxu0 %v857_v39  ;;  %v860_v42 = vld [vmem:[%s1218_s4 + $0x28] sm:$0xff]   ;;  %v312_v57 = vld [vmem:[%s945_s12 + $0x10] sm:$0xff] }
  0x30   : > { %767 = vmatprep.subr.bf16.mxu0 %v887_v9 }
  0x32   : > { %808 = vmatpush1.bf16.msra.mxu1 %v807_v48  ;;  %v310_v48 = vld [vmem:[%s945_s12] sm:$0xff] }
  0x33   : > { %810 = vmatprep.subr.bf16.mxu1 %v809_v51  ;;  %768 = vmatpush3.bf16.msra.mxu0 %v858_v40 }
  0x34   : > { %769 = vmatprep.subr.bf16.mxu0 %v887_v9 }
  0x36   : > { %812 = vmatpush1.bf16.msra.mxu1 %v811_v52 }
  0x37   : > { %814 = vmatprep.subr.bf16.mxu1 %v813_v53  ;;  %770 = vmatpush3.bf16.msra.mxu0 %v859_v41 }
  0x38   : > { %771 = vmatprep.subr.bf16.mxu0 %v887_v9 }
  0x39   : > { %443 = vmatmul.mubr.f32.vlgmr.msra.gmra.mrb[0].mxu1 %v308_v58 }
  0x3a   : > { %816 = vmatpush1.bf16.msra.mxu1 %v815_v59  ;;  %513 = vmatprep.mubr.f32.mxu1 %v887_v9 }
  0x3b   : > { %818 = vmatprep.subr.bf16.mxu1 %v817_v60  ;;  %772 = vmatpush3.bf16.msra.mxu0 %v860_v42 }
  0x3c   : > { %773 = vmatprep.subr.bf16.mxu0 %v887_v9 }
  0x3e   : > { %820 = vmatpush1.bf16.msra.mxu1 %v819_v1 }
  0x3f   : > { %822 = vmatprep.subr.bf16.mxu1 %v821_v2  ;;  %774 = vmatpush3.bf16.msra.mxu0 %v861_v43 }
  0x40   : > { %775 = vmatprep.subr.bf16.mxu0 %v887_v9 }
  0x42   : > { %824 = vmatpush1.bf16.msra.mxu1 %v823_v7 }
  0x43   : > { %826 = vmatprep.subr.bf16.mxu1 %v825_v8  ;;  %776 = vmatpush3.bf16.msra.mxu0 %v862_v44 }
  0x46   : > { %828 = vmatpush1.bf16.msra.mxu1 %v827_v14 }
  0x47   : > { %830 = vmatprep.subr.bf16.mxu1 %v829_v15 }
  0x4a   : > { %832 = vmatpush1.bf16.msra.mxu1 %v831_v20 }
  0x4b   : > { %834 = vmatprep.subr.bf16.mxu1 %v833_v21 }
  0x4e   : > { %836 = vmatpush1.bf16.msra.mxu1 %v835_v26 }
  0x4f   : > { %838 = vmatprep.subr.bf16.mxu1 %v837_v27 }
  0x52   : > { %840 = vmatpush1.bf16.msra.mxu1 %v839_v32 }
  0x53   : > { %842 = vmatprep.subr.bf16.mxu1 %v841_v33 }
  0x56   : > { %844 = vmatpush1.bf16.msra.mxu1 %v843_v36 }
  0x59   : > { %514 = vmatmul.mubr.f32.vlgmr.msra.gmra.mrb[2].mxu1 %v308_v58  ;;  %v313_v58 = vld [vmem:[%s945_s12 + $0x18] sm:$0xff] }
 0x10c   : > { %v444_v45 = vpop.f32.mrb[0].mxu1 }
 0x10d   : > { %v446_v46 = vpop.f32.mrb[1].mxu1  ;;  %v520_v50 = vadd.f32 %v444_v45, %v310_v48 }
 0x10e   : > { %v521_v49 = vadd.f32 %v446_v46, %v311_v47 }
 0x10f   : > { %v737_v52 = vmul.f32 -1.442695, %v520_v50 }
 0x110   : > { %v738_v51 = vmul.f32 -1.442695, %v521_v49 }
 0x112   : > { %863 = vpow2.f32 %v738_v51 }
 0x113   : > { %865 = vpow2.f32 %v737_v52 }
 0x11c   : > { %v864_v53 = vpop.eup %863 }
 0x11d   : > { %v866_v54 = vpop.eup %865  ;;  %v533_v55 = vadd.f32 1.0, %v864_v53 }
 0x11e   : > { %v527_v56 = vadd.f32 1.0, %v866_v54 }
 0x11f   : > { %867 = vrcp.f32 %v533_v55 }
 0x120   : > { %869 = vrcp.f32 %v527_v56 }
 0x129   : > { %v868_v63 = vpop.eup %867 }
 0x12a   : > { %v870_v1 = vpop.eup %869  ;;  %v543_v3 = vmul.f32 %v868_v63, %v309_v0 }
 0x12c   : > { %v515_v9 = vpop.f32.mrb[2].mxu1 }
 0x12d   : > { %v522_v59 = vadd.f32 %v515_v9, %v312_v57  ;;  %v517_v60 = vpop.f32.mrb[3].mxu1 }
 0x12e   : > { %v523_v61 = vadd.f32 %v517_v60, %v313_v58 }
 0x12f   : > { %871 = vtanh.f32 %v522_v59 }
 0x130   : > { %v739_v62 = vmul.f32 -1.442695, %v523_v61 }
 0x132   : > { %873 = vpow2.f32 %v739_v62 }
 0x139   : > { %v872_v2 = vpop.eup %871 }
 0x13a   : > { %v544_v4 = vmul.f32 %v872_v2, %v870_v1 }
 0x13c   : > { %v874_v5 = vpop.eup %873  ;;  %v545_v6 = vadd.f32 %v544_v4, %v543_v3 }
 0x13d   : > { %v540_v7 = vadd.f32 1.0, %v874_v5 }
 0x13e   : > { %875 = vtanh.f32 %v545_v6  ;;  %549 = vst [vmem:[%s1222_s8] sm:$0xff] %v545_v6 }
 0x13f   : > { %877 = vrcp.f32 %v540_v7 }
 0x148   : > { %v876_v8 = vpop.eup %875 }
 0x149   : > { %v878_v10 = vpop.eup %877 }
 0x14a   : > { %v547_v11 = vmul.f32 %v878_v10, %v876_v8 }
 0x14c   : > { %548 = vst [vmem:[%s1221_s7] sm:$0xff] %v547_v11  ;;  %v550_v12 = vpack.c.bf16 %v547_v11, %v547_v11 }
 0x14e   : > { %778 = vmatmul.mubr.bf16.vlgmr.msra.gmra.mrb[0].mxu0 %v550_v12 }
 0x221   : > { %v656_v14 = vpop.f32.mrb[0].mxu0 }
 0x222   : > { %v657_v15 = vadd.f32 %v740_v13, %v656_v14  ;;  %v779_v16 = vpop.f32.mrb[1].mxu0 }
 0x223   : > { %v659_v17 = vpop.f32.mrb[2].mxu0 }
 0x224   : > { %662 = vst [vmem:[%s950_s15] sm:$0xff] %v657_v15  ;;  %v780_v18 = vpop.f32.mrb[3].mxu0 }
 0x225 PF: > { %s19_s27 = sadd.s32 1, %s885_s27  }
 0x226   : > { %p16_p5 = scmp.ge.s32.totalorder %s19_s27, 10  }
 0x228   :  { %18 = sbr.rel (!%p16_p5) target bundleno = 1 (0x1), region = 94 }

</bundles_post_ra>
